<compile_context>
chip_gen: v5e
topology: v5e:2x2
jax: 0.10.0
libtpu: 0.0.40
codegen_flags: <defaults>
</compile_context>

<pallas_src>
import jax
import jax.numpy as jnp
from jax.experimental import pallas as pl
from jax.experimental.pallas import tpu as pltpu


EPS = 1e-5


def _bn_relu_kernel(x_ref, gamma_ref, beta_ref, o_ref):
    # x_ref:     (C, R)  where R = N*H*W  (channels on sublanes, spatial on lanes)
    # gamma_ref: (C, 1)
    # beta_ref:  (C, 1)
    # o_ref:     (C, R)
    x = x_ref[...].astype(jnp.float32)
    r = x.shape[1]
    inv_r = 1.0 / r

    # Per-channel batch statistics (reduce over the lane axis = N*H*W).
    mean = jnp.sum(x, axis=1, keepdims=True) * inv_r            # (C, 1)
    centered = x - mean
    var = jnp.sum(centered * centered, axis=1, keepdims=True) * inv_r  # biased
    inv_std = jax.lax.rsqrt(var + EPS)                          # (C, 1)

    # Fold affine: y = x * a + b   with a = gamma*inv_std, b = beta - mean*a
    a = gamma_ref[...].astype(jnp.float32) * inv_std            # (C, 1)
    b = beta_ref[...].astype(jnp.float32) - mean * a            # (C, 1)

    o_ref[...] = jnp.maximum(x * a + b, 0.0).astype(o_ref.dtype)


def batchnorm_relu(x_nchw, gamma, beta):
    """Training-mode BatchNorm2d + ReLU.  x_nchw: (N, C, H, W). Returns same shape."""
    N, C, H, W = x_nchw.shape

    if N == 1:
        # Free view: (1, C, H, W) -> (C, H*W), no data movement.
        x2d = x_nchw.reshape(C, H * W)
    else:
        # General-N fallback: one transpose to put channels leading.
        x2d = jnp.transpose(x_nchw, (1, 0, 2, 3)).reshape(C, N * H * W)

    out2d = pl.pallas_call(
        _bn_relu_kernel,
        out_shape=jax.ShapeDtypeStruct(x2d.shape, x_nchw.dtype),
        in_specs=[
            pl.BlockSpec(memory_space=pltpu.MemorySpace.VMEM),
            pl.BlockSpec(memory_space=pltpu.MemorySpace.VMEM),
            pl.BlockSpec(memory_space=pltpu.MemorySpace.VMEM),
        ],
        out_specs=pl.BlockSpec(memory_space=pltpu.MemorySpace.VMEM),
    )(x2d, gamma.reshape(C, 1), beta.reshape(C, 1))

    if N == 1:
        return out2d.reshape(N, C, H, W)
    return jnp.transpose(out2d.reshape(C, N, H, W), (1, 0, 2, 3))


def _reference(x_nchw, gamma, beta):
    # pure-JAX reference of training-mode BatchNorm2d + ReLU
    mean = jnp.mean(x_nchw, axis=(0, 2, 3), keepdims=True)
    var = jnp.mean((x_nchw - mean) ** 2, axis=(0, 2, 3), keepdims=True)
    g = gamma.reshape(1, -1, 1, 1)
    b = beta.reshape(1, -1, 1, 1)
    y = (x_nchw - mean) / jnp.sqrt(var + EPS) * g + b
    return jnp.maximum(y, 0.0)


if __name__ == "__main__":
    key = jax.random.PRNGKey(0)
    kx, kg, kb = jax.random.split(key, 3)

    N, C, H, W = 1, 336, 14, 14  # shapes implied by the module (BatchNorm2d(336))
    x = jax.random.normal(kx, (N, C, H, W), dtype=jnp.float32)
    # PyTorch default init is gamma=1, beta=0; perturb so the affine path is exercised.
    gamma = 1.0 + 0.1 * jax.random.normal(kg, (C,), dtype=jnp.float32)
    beta = 0.1 * jax.random.normal(kb, (C,), dtype=jnp.float32)

    out = batchnorm_relu(x, gamma, beta)
    out = jax.block_until_ready(out)

    ref = _reference(x, gamma, beta)
    assert out.shape == (N, C, H, W)
    assert jnp.allclose(out, ref, atol=1e-4, rtol=1e-4), "mismatch vs reference"

    print("KERNEL_OK")
</pallas_src>

<mosaic_0001>
module attributes {stable_mosaic.version = 11 : i64} {
  func.func @_bn_relu_kernel(%arg0: memref<336x196xf32, #tpu.memory_space<vmem>>, %arg1: memref<336x1xf32, #tpu.memory_space<vmem>>, %arg2: memref<336x1xf32, #tpu.memory_space<vmem>>, %arg3: memref<336x196xf32, #tpu.memory_space<vmem>>) attributes {dimension_semantics = [], scalar_prefetch = 0 : i64, scratch_operands = 0 : i64, tpu.core_type = #tpu.core_type<tc>} {
    %c0 = arith.constant 0 : index
    %c0_0 = arith.constant 0 : index
    %0 = vector.load %arg0[%c0, %c0_0] : memref<336x196xf32, #tpu.memory_space<vmem>>, vector<336x196xf32>
    %cst = arith.constant dense<0.000000e+00> : vector<336xf32>
    %1 = vector.multi_reduction <add>, %0, %cst [1] : vector<336x196xf32> to vector<336xf32>
    %2 = vector.shape_cast %1 : vector<336xf32> to vector<336x1xf32>
    %cst_1 = arith.constant 0.00510204071 : f32
    %3 = vector.broadcast %cst_1 : f32 to vector<336x1xf32>
    %4 = arith.mulf %2, %3 : vector<336x1xf32>
    %5 = vector.broadcast %4 : vector<336x1xf32> to vector<336x196xf32>
    %6 = arith.subf %0, %5 : vector<336x196xf32>
    %7 = arith.mulf %6, %6 : vector<336x196xf32>
    %cst_2 = arith.constant dense<0.000000e+00> : vector<336xf32>
    %8 = vector.multi_reduction <add>, %7, %cst_2 [1] : vector<336x196xf32> to vector<336xf32>
    %9 = vector.shape_cast %8 : vector<336xf32> to vector<336x1xf32>
    %cst_3 = arith.constant 0.00510204071 : f32
    %10 = vector.broadcast %cst_3 : f32 to vector<336x1xf32>
    %11 = arith.mulf %9, %10 : vector<336x1xf32>
    %cst_4 = arith.constant 9.99999974E-6 : f32
    %12 = vector.broadcast %cst_4 : f32 to vector<336x1xf32>
    %13 = arith.addf %11, %12 : vector<336x1xf32>
    %14 = math.rsqrt %13 : vector<336x1xf32>
    %c0_5 = arith.constant 0 : index
    %c0_6 = arith.constant 0 : index
    %15 = vector.load %arg1[%c0_5, %c0_6] : memref<336x1xf32, #tpu.memory_space<vmem>>, vector<336x1xf32>
    %16 = arith.mulf %15, %14 : vector<336x1xf32>
    %c0_7 = arith.constant 0 : index
    %c0_8 = arith.constant 0 : index
    %17 = vector.load %arg2[%c0_7, %c0_8] : memref<336x1xf32, #tpu.memory_space<vmem>>, vector<336x1xf32>
    %18 = arith.mulf %4, %16 : vector<336x1xf32>
    %19 = arith.subf %17, %18 : vector<336x1xf32>
    %20 = vector.broadcast %16 : vector<336x1xf32> to vector<336x196xf32>
    %21 = arith.mulf %0, %20 : vector<336x196xf32>
    %22 = vector.broadcast %19 : vector<336x1xf32> to vector<336x196xf32>
    %23 = arith.addf %21, %22 : vector<336x196xf32>
    %cst_9 = arith.constant 0.000000e+00 : f32
    %24 = vector.broadcast %cst_9 : f32 to vector<336x196xf32>
    %25 = arith.maximumf %23, %24 : vector<336x196xf32>
    %c0_10 = arith.constant 0 : index
    %c0_11 = arith.constant 0 : index
    %26 = vector.load %arg3[%c0_10, %c0_11] : memref<336x196xf32, #tpu.memory_space<vmem>>, vector<336x196xf32>
    tpu.vector_store %arg3[%c0_10, %c0_11], %25 {strides = array<i32>} : memref<336x196xf32, #tpu.memory_space<vmem>>, vector<336x196xf32>,
    return
  }
}

</mosaic_0001>

<bundles_post_ra>
// kernel: tpu_custom_call.1
= control target key start
LH: loop header
LB: loop body
LE: loop exit
PB: predicated region body
PF: predicated region fallthrough
CT: control target
= control target key end

     0   :  { %vm98_vm0 = vcmask 556032   ;;  %s5067_s0 = inlined_call_operand.vmem [shape: f32[336,196], index: 0, kind: input, shape index: {}]   ;;  %s5068_s1 = inlined_call_operand.vmem [shape: f32[336,1], index: 1, kind: input, shape index: {}]   ;;  %s5069_s2 = inlined_call_operand.vmem [shape: f32[336,1], index: 2, kind: input, shape index: {}]   ;;  %s5070_s3 = inlined_call_operand.vmem [shape: f32[336,196], index: 3, kind: output, shape index: {}]  }
   0x1   :  { %v2315_v0 = vld [vmem:[%s5067_s0 + $0x40] sm:$0xff]  ;;  %v2320_v1 = vld [vmem:[%s5067_s0 + $0x48] sm:$0xff]  ;;  %v2352_v10 = vld [vmem:[%s5067_s0 + $0x58] sm:$0xff] }
   0x2   :  { %v2325_v2 = vld [vmem:[%s5067_s0 + $0x20] sm:$0xff]  ;;  %v115_v3 = vsel %vm98_vm0, %v2320_v1, 0.0  ;;  %v2332_v4 = vld [vmem:[%s5067_s0 + $0x28] sm:$0xff]  ;;  %v2359_v13 = vld [vmem:[%s5067_s0 + $0x38] sm:$0xff]  ;;  %v119_v16 = vsel %vm98_vm0, %v2352_v10, 0.0 }
   0x3   :  { %v2337_v5 = vld [vmem:[%s5067_s0] sm:$0xff]  ;;  %v2342_v6 = vld [vmem:[%s5067_s0 + $0x8] sm:$0xff]  ;;  %v116_v7 = vadd.f32 %v115_v3, %v2315_v0  ;;  %v107_v8 = vsel %vm98_vm0, %v2332_v4, 0.0  ;;  %v2364_v14 = vld [vmem:[%s5067_s0 + $0x18] sm:$0xff]  ;;  %v111_v18 = vsel %vm98_vm0, %v2359_v13, 0.0 }
   0x4   :  { %v99_v9 = vsel %vm98_vm0, %v2342_v6, 0.0  ;;  %v108_v11 = vadd.f32 %v107_v8, %v2325_v2  ;;  %v2369_v15 = vld [vmem:[%s5067_s0 + $0x50] sm:$0xff]  ;;  %v103_v20 = vsel %vm98_vm0, %v2364_v14, 0.0  ;;  %v2393_v24 = vld [vmem:[%s5067_s0 + $0x88] sm:$0xff]  ;;  %v2403_v26 = vld [vmem:[%s5067_s0 + $0x78] sm:$0xff] }
   0x5   :  { %v100_v12 = vadd.f32 %v99_v9, %v2337_v5  ;;  %117 = vadd.xlane.f32.xlu2 %v116_v7  ;;  %v2376_v17 = vld [vmem:[%s5067_s0 + $0x30] sm:$0xff]  ;;  %v120_v21 = vadd.f32 %v119_v16, %v2369_v15  ;;  %v2398_v25 = vld [vmem:[%s5067_s0 + $0x68] sm:$0xff]  ;;  %v2408_v27 = vld [vmem:[%s5067_s0 + $0x80] sm:$0xff]  ;;  %v131_v28 = vsel %vm98_vm0, %v2393_v24, 0.0  ;;  %v127_v32 = vsel %vm98_vm0, %v2403_v26, 0.0 }
   0x6   :  { %109 = vadd.xlane.f32.xlu1 %v108_v11  ;;  %v2383_v19 = vld [vmem:[%s5067_s0 + $0x10] sm:$0xff]  ;;  %v112_v22 = vadd.f32 %v111_v18, %v2376_v17  ;;  %v2415_v29 = vld [vmem:[%s5067_s0 + $0x60] sm:$0xff]  ;;  %v123_v30 = vsel %vm98_vm0, %v2398_v25, 0.0  ;;  %v132_v33 = vadd.f32 %v131_v28, %v2408_v27  ;;  %v2432_v36 = vld [vmem:[%s5067_s0 + $0xb8] sm:$0xff] }
   0x7   :  { %101 = vadd.xlane.f32.xlu0 %v100_v12  ;;  %v104_v23 = vadd.f32 %v103_v20, %v2383_v19  ;;  %v2422_v31 = vld [vmem:[%s5067_s0 + $0x70] sm:$0xff]  ;;  %v124_v34 = vadd.f32 %v123_v30, %v2415_v29  ;;  %v2437_v37 = vld [vmem:[%s5067_s0 + $0x98] sm:$0xff]  ;;  %v2442_v38 = vld [vmem:[%s5067_s0 + $0xa8] sm:$0xff]  ;;  %v143_v40 = vsel %vm98_vm0, %v2432_v36, 0.0 }
   0x8   :  { %v128_v35 = vadd.f32 %v127_v32, %v2422_v31  ;;  %v2447_v39 = vld [vmem:[%s5067_s0 + $0xb0] sm:$0xff]  ;;  %v135_v42 = vsel %vm98_vm0, %v2437_v37, 0.0  ;;  %v2461_v43 = vld [vmem:[%s5067_s0 + $0xa0] sm:$0xff]  ;;  %v139_v44 = vsel %vm98_vm0, %v2442_v38, 0.0  ;;  %v2471_v48 = vld [vmem:[%s5067_s0 + $0xe8] sm:$0xff] }
   0x9   :  { %v2454_v41 = vld [vmem:[%s5067_s0 + $0x90] sm:$0xff]  ;;  %v144_v45 = vadd.f32 %v143_v40, %v2447_v39  ;;  %v140_v47 = vadd.f32 %v139_v44, %v2461_v43  ;;  %v2476_v49 = vld [vmem:[%s5067_s0 + $0xc8] sm:$0xff]  ;;  %v2481_v50 = vld [vmem:[%s5067_s0 + $0xd8] sm:$0xff]  ;;  %v155_v52 = vsel %vm98_vm0, %v2471_v48, 0.0 }
   0xa   :  { %v136_v46 = vadd.f32 %v135_v42, %v2454_v41  ;;  %v2486_v51 = vld [vmem:[%s5067_s0 + $0xe0] sm:$0xff]  ;;  %v147_v54 = vsel %vm98_vm0, %v2476_v49, 0.0  ;;  %v2500_v55 = vld [vmem:[%s5067_s0 + $0xd0] sm:$0xff]  ;;  %v151_v56 = vsel %vm98_vm0, %v2481_v50, 0.0  ;;  %v2510_v60 = vld [vmem:[%s5067_s0 + $0x118] sm:$0xff] }
   0xb   :  { %v2493_v53 = vld [vmem:[%s5067_s0 + $0xc0] sm:$0xff]  ;;  %v156_v57 = vadd.f32 %v155_v52, %v2486_v51  ;;  %v152_v59 = vadd.f32 %v151_v56, %v2500_v55  ;;  %v2515_v61 = vld [vmem:[%s5067_s0 + $0xf8] sm:$0xff]  ;;  %v2520_v62 = vld [vmem:[%s5067_s0 + $0x108] sm:$0xff]  ;;  %v167_v3 = vsel %vm98_vm0, %v2510_v60, 0.0 }
   0xc   :  { %v148_v58 = vadd.f32 %v147_v54, %v2493_v53  ;;  %v2525_v63 = vld [vmem:[%s5067_s0 + $0x110] sm:$0xff]  ;;  %v159_v8 = vsel %vm98_vm0, %v2515_v61, 0.0  ;;  %v2539_v9 = vld [vmem:[%s5067_s0 + $0x100] sm:$0xff]  ;;  %v163_v11 = vsel %vm98_vm0, %v2520_v62, 0.0  ;;  %v2549_v20 = vld [vmem:[%s5067_s0 + $0x148] sm:$0xff] }
   0xd   :  { %121 = vadd.xlane.f32.xlu2 %v120_v21  ;;  %v2532_v7 = vld [vmem:[%s5067_s0 + $0xf0] sm:$0xff]  ;;  %v168_v12 = vadd.f32 %v167_v3, %v2525_v63  ;;  %v164_v18 = vadd.f32 %v163_v11, %v2539_v9  ;;  %v2554_v21 = vld [vmem:[%s5067_s0 + $0x128] sm:$0xff]  ;;  %v179_v28 = vsel %vm98_vm0, %v2549_v20, 0.0  ;;  %v2571_v30 = vld [vmem:[%s5067_s0 + $0x120] sm:$0xff] }
   0xe   :  { %113 = vadd.xlane.f32.xlu1 %v112_v22  ;;  %v160_v16 = vadd.f32 %v159_v8, %v2532_v7  ;;  %v2559_v22 = vld [vmem:[%s5067_s0 + $0x138] sm:$0xff]  ;;  %v171_v32 = vsel %vm98_vm0, %v2554_v21, 0.0  ;;  %v2610_v54 = vld [vmem:[%s5067_s0 + $0x150] sm:$0xff]  ;;  %v2627_v11 = vld [vmem:[%s5067_s0 + $0x1a8] sm:$0xff] }
   0xf   :  { %105 = vadd.xlane.f32.xlu0 %v104_v23  ;;  %v2564_v23 = vld [vmem:[%s5067_s0 + $0x140] sm:$0xff]  ;;  %v172_v40 = vadd.f32 %v171_v32, %v2571_v30  ;;  %v2588_v44 = vld [vmem:[%s5067_s0 + $0x178] sm:$0xff]  ;;  %5156 = vst [vmem:[#allocation3_spill] sm:$0xff] %v2627_v11 }
  0x10   :  { %v191_v52 = vsel %vm98_vm0, %v2588_v44, 0.0  ;;  %v2649_v32 = vld [vmem:[%s5067_s0 + $0x180] sm:$0xff] }
  0x11   :  { %5160 = vst [vmem:[#allocation7_spill] sm:$0xff] %v2649_v32 }
  0x15   :  { %133 = vadd.xlane.f32.xlu2 %v132_v33  ;;  %v2578_v33 = vld [vmem:[%s5067_s0 + $0x130] sm:$0xff] }
  0x16   :  { %129 = vadd.xlane.f32.xlu1 %v128_v35  ;;  %v180_v35 = vadd.f32 %v179_v28, %v2564_v23  ;;  %v203_v28 = vsel %vm98_vm0, %v2627_v11, 0.0 }
  0x17   :  { %125 = vadd.xlane.f32.xlu0 %v124_v34  ;;  %v175_v34 = vsel %vm98_vm0, %v2559_v22, 0.0 }
  0x18   :  { %v176_v42 = vadd.f32 %v175_v34, %v2578_v33 }
  0x1d   :  { %145 = vadd.xlane.f32.xlu2 %v144_v45  ;;  %v2593_v45 = vld [vmem:[%s5067_s0 + $0x158] sm:$0xff] }
  0x1e   :  { %141 = vadd.xlane.f32.xlu1 %v140_v47  ;;  %v2603_v47 = vld [vmem:[%s5067_s0 + $0x170] sm:$0xff]  ;;  %v183_v56 = vsel %vm98_vm0, %v2593_v45, 0.0 }
  0x1f   :  { %137 = vadd.xlane.f32.xlu0 %v136_v46  ;;  %v2598_v46 = vld [vmem:[%s5067_s0 + $0x168] sm:$0xff]  ;;  %v184_v3 = vadd.f32 %v183_v56, %v2610_v54 }
  0x25   :  { %157 = vadd.xlane.f32.xlu2 %v156_v57  ;;  %v2617_v57 = vld [vmem:[%s5067_s0 + $0x160] sm:$0xff] }
  0x26   :  { %153 = vadd.xlane.f32.xlu1 %v152_v59  ;;  %5155 = vst [vmem:[#allocation2_spill] sm:$0xff] %v2617_v57  ;;  %v192_v59 = vadd.f32 %v191_v52, %v2603_v47 }
  0x27   :  { %149 = vadd.xlane.f32.xlu0 %v148_v58  ;;  %v187_v58 = vsel %vm98_vm0, %v2598_v46, 0.0 }
  0x28   :  { %v188_v8 = vadd.f32 %v187_v58, %v2617_v57  ;;  %v2666_v58 = vld [vmem:[%s5067_s0 + $0x1d8] sm:$0xff] }
  0x29   :  { %5162 = vst [vmem:[#allocation9_spill] sm:$0xff] %v2666_v58 }
  0x2d   :  { %169 = vadd.xlane.f32.xlu2 %v168_v12  ;;  %v2632_v12 = vld [vmem:[%s5067_s0 + $0x188] sm:$0xff] }
  0x2e   :  { %165 = vadd.xlane.f32.xlu1 %v164_v18  ;;  %5157 = vst [vmem:[#allocation4_spill] sm:$0xff] %v2632_v12  ;;  %v2642_v18 = vld [vmem:[%s5067_s0 + $0x1a0] sm:$0xff]  ;;  %v195_v34 = vsel %vm98_vm0, %v2632_v12, 0.0 }
  0x2f   :  { %161 = vadd.xlane.f32.xlu0 %v160_v16  ;;  %v2637_v16 = vld [vmem:[%s5067_s0 + $0x198] sm:$0xff]  ;;  %5159 = vst [vmem:[#allocation6_spill] sm:$0xff] %v2642_v18  ;;  %v196_v52 = vadd.f32 %v195_v34, %v2649_v32  ;;  %v2688_v34 = vld [vmem:[%s5067_s0 + $0x1b0] sm:$0xff] }
  0x30   :  { %5158 = vst [vmem:[#allocation5_spill] sm:$0xff] %v2637_v16 }
  0x31   :  { %5166 = vst [vmem:[#allocation13_spill] sm:$0xff] %v2688_v34 }
  0x35   :  { %181 = vadd.xlane.f32.xlu2 %v180_v35  ;;  %v2656_v35 = vld [vmem:[%s5067_s0 + $0x190] sm:$0xff] }
  0x36   :  { %177 = vadd.xlane.f32.xlu1 %v176_v42  ;;  %5161 = vst [vmem:[#allocation8_spill] sm:$0xff] %v2656_v35  ;;  %v204_v42 = vadd.f32 %v203_v28, %v2642_v18  ;;  %v215_v28 = vsel %vm98_vm0, %v2666_v58, 0.0 }
  0x37   :  { %173 = vadd.xlane.f32.xlu0 %v172_v40  ;;  %v199_v40 = vsel %vm98_vm0, %v2637_v16, 0.0  ;;  %v2705_v16 = vld [vmem:[%s5067_s0 + $0x208] sm:$0xff] }
  0x38   :  { %v200_v56 = vadd.f32 %v199_v40, %v2656_v35  ;;  %5168 = vst [vmem:[#allocation15_spill] sm:$0xff] %v2705_v16 }
  0x3d   :  { %193 = vadd.xlane.f32.xlu2 %v192_v59  ;;  %v2671_v59 = vld [vmem:[%s5067_s0 + $0x1b8] sm:$0xff] }
  0x3e   :  { %189 = vadd.xlane.f32.xlu1 %v188_v8  ;;  %5163 = vst [vmem:[#allocation10_spill] sm:$0xff] %v2671_v59  ;;  %v2681_v8 = vld [vmem:[%s5067_s0 + $0x1d0] sm:$0xff]  ;;  %v207_v40 = vsel %vm98_vm0, %v2671_v59, 0.0  ;;  %v2710_v59 = vld [vmem:[%s5067_s0 + $0x1e8] sm:$0xff] }
  0x3f   :  { %185 = vadd.xlane.f32.xlu0 %v184_v3  ;;  %v2676_v3 = vld [vmem:[%s5067_s0 + $0x1c8] sm:$0xff]  ;;  %5165 = vst [vmem:[#allocation12_spill] sm:$0xff] %v2681_v8  ;;  %v208_v58 = vadd.f32 %v207_v40, %v2688_v34  ;;  %v227_v40 = vsel %vm98_vm0, %v2705_v16, 0.0 }
  0x40   :  { %5164 = vst [vmem:[#allocation11_spill] sm:$0xff] %v2676_v3 }
  0x41   :  { %5169 = vst [vmem:[#allocation16_spill] sm:$0xff] %v2710_v59 }
  0x45   :  { %205 = vadd.xlane.f32.xlu2 %v204_v42  ;;  %v2695_v42 = vld [vmem:[%s5067_s0 + $0x1c0] sm:$0xff] }
  0x46   :  { %201 = vadd.xlane.f32.xlu1 %v200_v56  ;;  %5167 = vst [vmem:[#allocation14_spill] sm:$0xff] %v2695_v42  ;;  %v216_v56 = vadd.f32 %v215_v28, %v2681_v8  ;;  %v2720_v28 = vld [vmem:[%s5067_s0 + $0x200] sm:$0xff]  ;;  %v2744_v8 = vld [vmem:[%s5067_s0 + $0x238] sm:$0xff] }
  0x47   :  { %197 = vadd.xlane.f32.xlu0 %v196_v52  ;;  %v211_v52 = vsel %vm98_vm0, %v2676_v3, 0.0  ;;  %v2715_v3 = vld [vmem:[%s5067_s0 + $0x1f8] sm:$0xff]  ;;  %5171 = vst [vmem:[#allocation18_spill] sm:$0xff] %v2720_v28 }
  0x48   :  { %v212_v35 = vadd.f32 %v211_v52, %v2695_v42  ;;  %5170 = vst [vmem:[#allocation17_spill] sm:$0xff] %v2715_v3  ;;  %v2727_v52 = vld [vmem:[%s5067_s0 + $0x1e0] sm:$0xff]  ;;  %v219_v42 = vsel %vm98_vm0, %v2710_v59, 0.0  ;;  %v2749_v59 = vld [vmem:[%s5067_s0 + $0x218] sm:$0xff] }
  0x49   :  { %5172 = vst [vmem:[#allocation19_spill] sm:$0xff] %v2727_v52  ;;  %v220_v16 = vadd.f32 %v219_v42, %v2727_v52  ;;  %v2759_v42 = vld [vmem:[%s5067_s0 + $0x230] sm:$0xff] }
  0x4a   :  { %5174 = vst [vmem:[#allocation21_spill] sm:$0xff] %v2744_v8 }
  0x4b   :  { %5175 = vst [vmem:[#allocation22_spill] sm:$0xff] %v2749_v59 }
  0x4c   :  { %5177 = vst [vmem:[#allocation24_spill] sm:$0xff] %v2759_v42 }
  0x4d   :  { %217 = vadd.xlane.f32.xlu2 %v216_v56  ;;  %v228_v56 = vadd.f32 %v227_v40, %v2720_v28  ;;  %v239_v40 = vsel %vm98_vm0, %v2744_v8, 0.0  ;;  %v2783_v28 = vld [vmem:[%s5067_s0 + $0x268] sm:$0xff] }
  0x4e   :  { %213 = vadd.xlane.f32.xlu1 %v212_v35  ;;  %v2734_v35 = vld [vmem:[%s5067_s0 + $0x1f0] sm:$0xff]  ;;  %5180 = vst [vmem:[#allocation27_spill] sm:$0xff] %v2783_v28 }
  0x4f   :  { %209 = vadd.xlane.f32.xlu0 %v208_v58  ;;  %5173 = vst [vmem:[#allocation20_spill] sm:$0xff] %v2734_v35  ;;  %v223_v58 = vsel %vm98_vm0, %v2715_v3, 0.0  ;;  %v2754_v3 = vld [vmem:[%s5067_s0 + $0x228] sm:$0xff] }
  0x50   :  { %v224_v34 = vadd.f32 %v223_v58, %v2734_v35  ;;  %5176 = vst [vmem:[#allocation23_spill] sm:$0xff] %v2754_v3  ;;  %v2766_v58 = vld [vmem:[%s5067_s0 + $0x210] sm:$0xff]  ;;  %v231_v35 = vsel %vm98_vm0, %v2749_v59, 0.0  ;;  %v2788_v59 = vld [vmem:[%s5067_s0 + $0x248] sm:$0xff] }
  0x51   :  { %5178 = vst [vmem:[#allocation25_spill] sm:$0xff] %v2766_v58  ;;  %v232_v8 = vadd.f32 %v231_v35, %v2766_v58  ;;  %v2798_v35 = vld [vmem:[%s5067_s0 + $0x260] sm:$0xff] }
  0x52   :  { %5181 = vst [vmem:[#allocation28_spill] sm:$0xff] %v2788_v59 }
  0x53   :  { %5183 = vst [vmem:[#allocation30_spill] sm:$0xff] %v2798_v35 }
  0x55   :  { %229 = vadd.xlane.f32.xlu2 %v228_v56  ;;  %v240_v56 = vadd.f32 %v239_v40, %v2759_v42  ;;  %v251_v40 = vsel %vm98_vm0, %v2783_v28, 0.0  ;;  %v2822_v42 = vld [vmem:[%s5067_s0 + $0x298] sm:$0xff] }
  0x56   :  { %225 = vadd.xlane.f32.xlu1 %v224_v34  ;;  %v235_v34 = vsel %vm98_vm0, %v2754_v3, 0.0  ;;  %v2793_v3 = vld [vmem:[%s5067_s0 + $0x258] sm:$0xff]  ;;  %5186 = vst [vmem:[#allocation33_spill] sm:$0xff] %v2822_v42 }
  0x57   :  { %221 = vadd.xlane.f32.xlu0 %v220_v16  ;;  %v2773_v16 = vld [vmem:[%s5067_s0 + $0x220] sm:$0xff]  ;;  %5182 = vst [vmem:[#allocation29_spill] sm:$0xff] %v2793_v3 }
  0x58   :  { %5179 = vst [vmem:[#allocation26_spill] sm:$0xff] %v2773_v16  ;;  %v236_v52 = vadd.f32 %v235_v34, %v2773_v16  ;;  %v2805_v34 = vld [vmem:[%s5067_s0 + $0x240] sm:$0xff]  ;;  %v243_v16 = vsel %vm98_vm0, %v2788_v59, 0.0  ;;  %v2827_v59 = vld [vmem:[%s5067_s0 + $0x278] sm:$0xff] }
  0x59   :  { %5184 = vst [vmem:[#allocation31_spill] sm:$0xff] %v2805_v34  ;;  %v244_v28 = vadd.f32 %v243_v16, %v2805_v34  ;;  %v2837_v16 = vld [vmem:[%s5067_s0 + $0x290] sm:$0xff] }
  0x5a   :  { %5187 = vst [vmem:[#allocation34_spill] sm:$0xff] %v2827_v59 }
  0x5b   :  { %5189 = vst [vmem:[#allocation36_spill] sm:$0xff] %v2837_v16 }
  0x5d   :  { %241 = vadd.xlane.f32.xlu2 %v240_v56  ;;  %v252_v56 = vadd.f32 %v251_v40, %v2798_v35  ;;  %v263_v40 = vsel %vm98_vm0, %v2822_v42, 0.0 }
  0x5e   :  { %237 = vadd.xlane.f32.xlu1 %v236_v52  ;;  %v247_v52 = vsel %vm98_vm0, %v2793_v3, 0.0  ;;  %v2832_v3 = vld [vmem:[%s5067_s0 + $0x288] sm:$0xff] }
  0x5f   :  { %233 = vadd.xlane.f32.xlu0 %v232_v8  ;;  %v2812_v8 = vld [vmem:[%s5067_s0 + $0x250] sm:$0xff]  ;;  %5188 = vst [vmem:[#allocation35_spill] sm:$0xff] %v2832_v3 }
  0x60   :  { %5185 = vst [vmem:[#allocation32_spill] sm:$0xff] %v2812_v8  ;;  %v248_v58 = vadd.f32 %v247_v52, %v2812_v8  ;;  %v2844_v52 = vld [vmem:[%s5067_s0 + $0x270] sm:$0xff]  ;;  %v255_v8 = vsel %vm98_vm0, %v2827_v59, 0.0 }
  0x61   :  { %5190 = vst [vmem:[#allocation37_spill] sm:$0xff] %v2844_v52  ;;  %v256_v42 = vadd.f32 %v255_v8, %v2844_v52 }
  0x65   :  { %253 = vadd.xlane.f32.xlu2 %v252_v56  ;;  %v264_v56 = vadd.f32 %v263_v40, %v2837_v16 }
  0x66   :  { %249 = vadd.xlane.f32.xlu1 %v248_v58  ;;  %v259_v58 = vsel %vm98_vm0, %v2832_v3, 0.0 }
  0x67   :  { %245 = vadd.xlane.f32.xlu0 %v244_v28  ;;  %v2851_v28 = vld [vmem:[%s5067_s0 + $0x280] sm:$0xff] }
  0x68   :  { %5191 = vst [vmem:[#allocation38_spill] sm:$0xff] %v2851_v28  ;;  %v260_v34 = vadd.f32 %v259_v58, %v2851_v28 }
  0x6d   :  { %265 = vadd.xlane.f32.xlu2 %v264_v56 }
  0x6e   :  { %261 = vadd.xlane.f32.xlu1 %v260_v34 }
  0x6f   :  { %257 = vadd.xlane.f32.xlu0 %v256_v42 }
  0x78   :  { %v118_v35 = vpop.xlane.xlu2 %117 }
  0x79   :  { %v110_v12 = vpop.xlane.xlu1 %109  ;;  %v2872_v52 = vmul.f32 0.0051020407, %v118_v35 }
  0x7a   :  { %v102_v59 = vpop.xlane.xlu0 %101  ;;  %v2858_v32 = vmul.f32 0.0051020407, %v110_v12 }
  0x7b   :  { %v2860_v11 = vmul.f32 0.0051020407, %v102_v59 }
  0x7c   :  { %5192 = vst [vmem:[#allocation39_spill] sm:$0xff] %v2858_v32  ;;  %v313_v18 = vsub.f32 %v2325_v2, %v2858_v32  ;;  %v314_v40 = vsub.f32 %v2332_v4, %v2858_v32 }
  0x7d   :  { %v309_v8 = vsub.f32 %v2337_v5, %v2860_v11  ;;  %v310_v42 = vsub.f32 %v2342_v6, %v2860_v11 }
  0x7e   :  { %v397_v34 = vmul.f32 %v313_v18, %v313_v18  ;;  %v398_v58 = vmul.f32 %v314_v40, %v314_v40 }
  0x7f   :  { %v393_v56 = vmul.f32 %v309_v8, %v309_v8  ;;  %v394_v28 = vmul.f32 %v310_v42, %v310_v42 }
  0x80   :  { %v122_v12 = vpop.xlane.xlu2 %121  ;;  %v485_v59 = vsel %vm98_vm0, %v398_v58, 0.0 }
  0x81   :  { %v477_v3 = vsel %vm98_vm0, %v394_v28, 0.0  ;;  %v2874_v2 = vmul.f32 0.0051020407, %v122_v12  ;;  %v114_v4 = vpop.xlane.xlu1 %113  ;;  %v486_v16 = vadd.f32 %v485_v59, %v397_v34 }
  0x82   :  { %v106_v32 = vpop.xlane.xlu0 %105  ;;  %v478_v5 = vadd.f32 %v477_v3, %v393_v56  ;;  %v2876_v57 = vmul.f32 0.0051020407, %v114_v4 }
  0x83   :  { %v2878_v6 = vmul.f32 0.0051020407, %v106_v32  ;;  %487 = vadd.xlane.f32.xlu2 %v486_v16  ;;  %v319_v18 = vsub.f32 %v2369_v15, %v2874_v2  ;;  %v320_v28 = vsub.f32 %v2352_v10, %v2874_v2  ;;  %v318_v15 = vsub.f32 %v2320_v1, %v2872_v52 }
  0x84   :  { %479 = vadd.xlane.f32.xlu0 %v478_v5  ;;  %v315_v35 = vsub.f32 %v2376_v17, %v2876_v57  ;;  %v316_v40 = vsub.f32 %v2359_v13, %v2876_v57 }
  0x85   :  { %v311_v3 = vsub.f32 %v2383_v19, %v2878_v6  ;;  %v312_v32 = vsub.f32 %v2364_v14, %v2878_v6  ;;  %v403_v16 = vmul.f32 %v319_v18, %v319_v18  ;;  %v404_v8 = vmul.f32 %v320_v28, %v320_v28 }
  0x86   :  { %v399_v42 = vmul.f32 %v315_v35, %v315_v35  ;;  %v400_v34 = vmul.f32 %v316_v40, %v316_v40  ;;  %v317_v14 = vsub.f32 %v2315_v0, %v2872_v52  ;;  %v402_v28 = vmul.f32 %v318_v15, %v318_v15 }
  0x87   :  { %v395_v10 = vmul.f32 %v311_v3, %v311_v3  ;;  %v396_v58 = vmul.f32 %v312_v32, %v312_v32  ;;  %v497_v17 = vsel %vm98_vm0, %v404_v8, 0.0 }
  0x88   :  { %v134_v56 = vpop.xlane.xlu2 %133  ;;  %v498_v12 = vadd.f32 %v497_v17, %v403_v16  ;;  %v489_v13 = vsel %vm98_vm0, %v400_v34, 0.0  ;;  %v401_v0 = vmul.f32 %v317_v14, %v317_v14  ;;  %v493_v34 = vsel %vm98_vm0, %v402_v28, 0.0 }
  0x89   :  { %v481_v19 = vsel %vm98_vm0, %v396_v58, 0.0  ;;  %v2899_v59 = vmul.f32 0.0051020407, %v134_v56  ;;  %v490_v5 = vadd.f32 %v489_v13, %v399_v42  ;;  %v130_v18 = vpop.xlane.xlu1 %129 }
  0x8a   :  { %v126_v4 = vpop.xlane.xlu0 %125  ;;  %v482_v1 = vadd.f32 %v481_v19, %v395_v10  ;;  %v2903_v40 = vmul.f32 0.0051020407, %v130_v18 }
  0x8b   :  { %v2901_v35 = vmul.f32 0.0051020407, %v126_v4  ;;  %499 = vadd.xlane.f32.xlu2 %v498_v12  ;;  %v325_v3 = vsub.f32 %v2408_v27, %v2899_v59  ;;  %v326_v32 = vsub.f32 %v2393_v24, %v2899_v59  ;;  %v494_v12 = vadd.f32 %v493_v34, %v401_v0 }
  0x8c   :  { %491 = vadd.xlane.f32.xlu0 %v490_v5  ;;  %483 = vadd.xlane.f32.xlu1 %v482_v1  ;;  %v324_v10 = vsub.f32 %v2403_v26, %v2903_v40 }
  0x8d   :  { %v321_v16 = vsub.f32 %v2415_v29, %v2901_v35  ;;  %v322_v8 = vsub.f32 %v2398_v25, %v2901_v35  ;;  %v409_v15 = vmul.f32 %v325_v3, %v325_v3  ;;  %v410_v42 = vmul.f32 %v326_v32, %v326_v32 }
  0x8e   :  { %v323_v29 = vsub.f32 %v2422_v31, %v2903_v40  ;;  %v408_v5 = vmul.f32 %v324_v10, %v324_v10 }
  0x8f   :  { %v405_v58 = vmul.f32 %v321_v16, %v321_v16  ;;  %v406_v27 = vmul.f32 %v322_v8, %v322_v8  ;;  %v509_v17 = vsel %vm98_vm0, %v410_v42, 0.0 }
  0x90   :  { %v146_v24 = vpop.xlane.xlu2 %145  ;;  %v510_v56 = vadd.f32 %v509_v17, %v409_v15  ;;  %v407_v31 = vmul.f32 %v323_v29, %v323_v29  ;;  %v505_v8 = vsel %vm98_vm0, %v408_v5, 0.0 }
  0x91   :  { %v501_v13 = vsel %vm98_vm0, %v406_v27, 0.0  ;;  %v2920_v25 = vmul.f32 0.0051020407, %v146_v24  ;;  %v142_v4 = vpop.xlane.xlu1 %141 }
  0x92   :  { %v138_v19 = vpop.xlane.xlu0 %137  ;;  %v502_v14 = vadd.f32 %v501_v13, %v405_v58  ;;  %v2924_v26 = vmul.f32 0.0051020407, %v142_v4  ;;  %v506_v58 = vadd.f32 %v505_v8, %v407_v31 }
  0x93   :  { %v2922_v1 = vmul.f32 0.0051020407, %v138_v19  ;;  %511 = vadd.xlane.f32.xlu2 %v510_v56  ;;  %v331_v18 = vsub.f32 %v2447_v39, %v2920_v25  ;;  %v332_v28 = vsub.f32 %v2432_v36, %v2920_v25 }
  0x94   :  { %503 = vadd.xlane.f32.xlu0 %v502_v14  ;;  %495 = vadd.xlane.f32.xlu1 %v494_v12  ;;  %v330_v15 = vsub.f32 %v2442_v38, %v2924_v26 }
  0x95   :  { %5193 = vst [vmem:[#allocation40_spill] sm:$0xff] %v2922_v1  ;;  %v327_v3 = vsub.f32 %v2454_v41, %v2922_v1  ;;  %v328_v32 = vsub.f32 %v2437_v37, %v2922_v1  ;;  %v415_v0 = vmul.f32 %v331_v18, %v331_v18  ;;  %v416_v16 = vmul.f32 %v332_v28, %v332_v28 }
  0x96   :  { %v329_v41 = vsub.f32 %v2461_v43, %v2924_v26  ;;  %v414_v12 = vmul.f32 %v330_v15, %v330_v15 }
  0x97   :  { %v411_v42 = vmul.f32 %v327_v3, %v327_v3  ;;  %v412_v39 = vmul.f32 %v328_v32, %v328_v32  ;;  %v521_v34 = vsel %vm98_vm0, %v416_v16, 0.0 }
  0x98   :  { %v158_v36 = vpop.xlane.xlu2 %157  ;;  %v522_v10 = vadd.f32 %v521_v34, %v415_v0  ;;  %v413_v43 = vmul.f32 %v329_v41, %v329_v41  ;;  %v517_v28 = vsel %vm98_vm0, %v414_v12, 0.0 }
  0x99   :  { %v513_v27 = vsel %vm98_vm0, %v412_v39, 0.0  ;;  %v2941_v37 = vmul.f32 0.0051020407, %v158_v36  ;;  %v154_v56 = vpop.xlane.xlu1 %153 }
  0x9a   :  { %v150_v17 = vpop.xlane.xlu0 %149  ;;  %v514_v24 = vadd.f32 %v513_v27, %v411_v42  ;;  %v2945_v38 = vmul.f32 0.0051020407, %v154_v56  ;;  %v518_v16 = vadd.f32 %v517_v28, %v413_v43 }
  0x9b   :  { %5194 = vst [vmem:[#allocation41_spill] sm:$0xff] %v2941_v37  ;;  %v2943_v13 = vmul.f32 0.0051020407, %v150_v17  ;;  %523 = vadd.xlane.f32.xlu2 %v522_v10  ;;  %v337_v29 = vsub.f32 %v2486_v51, %v2941_v37  ;;  %v338_v19 = vsub.f32 %v2471_v48, %v2941_v37 }
  0x9c   :  { %5196 = vst [vmem:[#allocation43_spill] sm:$0xff] %v2945_v38  ;;  %515 = vadd.xlane.f32.xlu0 %v514_v24  ;;  %507 = vadd.xlane.f32.xlu1 %v506_v58  ;;  %v336_v31 = vsub.f32 %v2481_v50, %v2945_v38 }
  0x9d   :  { %5195 = vst [vmem:[#allocation42_spill] sm:$0xff] %v2943_v13  ;;  %v333_v14 = vsub.f32 %v2493_v53, %v2943_v13  ;;  %v334_v4 = vsub.f32 %v2476_v49, %v2943_v13  ;;  %v421_v5 = vmul.f32 %v337_v29, %v337_v29  ;;  %v422_v18 = vmul.f32 %v338_v19, %v338_v19 }
  0x9e   :  { %v335_v53 = vsub.f32 %v2500_v55, %v2945_v38  ;;  %v420_v34 = vmul.f32 %v336_v31, %v336_v31 }
  0x9f   :  { %v417_v3 = vmul.f32 %v333_v14, %v333_v14  ;;  %v418_v51 = vmul.f32 %v334_v4, %v334_v4  ;;  %v533_v32 = vsel %vm98_vm0, %v422_v18, 0.0 }
  0xa0   :  { %v170_v48 = vpop.xlane.xlu2 %169  ;;  %v534_v0 = vadd.f32 %v533_v32, %v421_v5  ;;  %v419_v55 = vmul.f32 %v335_v53, %v335_v53  ;;  %v529_v56 = vsel %vm98_vm0, %v420_v34, 0.0 }
  0xa1   :  { %v525_v8 = vsel %vm98_vm0, %v418_v51, 0.0  ;;  %v2962_v49 = vmul.f32 0.0051020407, %v170_v48  ;;  %v166_v39 = vpop.xlane.xlu1 %165 }
  0xa2   :  { %v162_v15 = vpop.xlane.xlu0 %161  ;;  %v526_v42 = vadd.f32 %v525_v8, %v417_v3  ;;  %v2966_v50 = vmul.f32 0.0051020407, %v166_v39  ;;  %v530_v14 = vadd.f32 %v529_v56, %v419_v55 }
  0xa3   :  { %5197 = vst [vmem:[#allocation44_spill] sm:$0xff] %v2962_v49  ;;  %v2964_v36 = vmul.f32 0.0051020407, %v162_v15  ;;  %535 = vadd.xlane.f32.xlu2 %v534_v0  ;;  %v343_v10 = vsub.f32 %v2525_v63, %v2962_v49  ;;  %v344_v58 = vsub.f32 %v2510_v60, %v2962_v49 }
  0xa4   :  { %5199 = vst [vmem:[#allocation46_spill] sm:$0xff] %v2966_v50  ;;  %527 = vadd.xlane.f32.xlu0 %v526_v42  ;;  %519 = vadd.xlane.f32.xlu1 %v518_v16  ;;  %v342_v12 = vsub.f32 %v2520_v62, %v2966_v50 }
  0xa5   :  { %5198 = vst [vmem:[#allocation45_spill] sm:$0xff] %v2964_v36  ;;  %v339_v27 = vsub.f32 %v2532_v7, %v2964_v36  ;;  %v340_v41 = vsub.f32 %v2515_v61, %v2964_v36  ;;  %v427_v17 = vmul.f32 %v343_v10, %v343_v10  ;;  %v428_v24 = vmul.f32 %v344_v58, %v344_v58 }
  0xa6   :  { %v341_v7 = vsub.f32 %v2539_v9, %v2966_v50  ;;  %v426_v31 = vmul.f32 %v342_v12, %v342_v12 }
  0xa7   :  { %v423_v29 = vmul.f32 %v339_v27, %v339_v27  ;;  %v424_v63 = vmul.f32 %v340_v41, %v340_v41  ;;  %v545_v19 = vsel %vm98_vm0, %v428_v24, 0.0 }
  0xa8   :  { %v182_v60 = vpop.xlane.xlu2 %181  ;;  %v546_v43 = vadd.f32 %v545_v19, %v427_v17  ;;  %v425_v9 = vmul.f32 %v341_v7, %v341_v7  ;;  %v541_v53 = vsel %vm98_vm0, %v426_v31, 0.0 }
  0xa9   :  { %v537_v4 = vsel %vm98_vm0, %v424_v63, 0.0  ;;  %v2983_v61 = vmul.f32 0.0051020407, %v182_v60  ;;  %v178_v28 = vpop.xlane.xlu1 %177 }
  0xaa   :  { %v174_v5 = vpop.xlane.xlu0 %173  ;;  %v538_v18 = vadd.f32 %v537_v4, %v423_v29  ;;  %v2987_v62 = vmul.f32 0.0051020407, %v178_v28  ;;  %v542_v10 = vadd.f32 %v541_v53, %v425_v9  ;;  %v5211_v53 = vld [vmem:[#allocation3_spill] sm:$0xff] }
  0xab   :  { %5200 = vst [vmem:[#allocation47_spill] sm:$0xff] %v2983_v61  ;;  %v2985_v3 = vmul.f32 0.0051020407, %v174_v5  ;;  %547 = vadd.xlane.f32.xlu2 %v546_v43  ;;  %v349_v51 = vsub.f32 %v2564_v23, %v2983_v61  ;;  %v350_v32 = vsub.f32 %v2549_v20, %v2983_v61 }
  0xac   :  { %5202 = vst [vmem:[#allocation49_spill] sm:$0xff] %v2987_v62  ;;  %539 = vadd.xlane.f32.xlu0 %v538_v18  ;;  %531 = vadd.xlane.f32.xlu1 %v530_v14  ;;  %v348_v15 = vsub.f32 %v2559_v22, %v2987_v62 }
  0xad   :  { %5201 = vst [vmem:[#allocation48_spill] sm:$0xff] %v2985_v3  ;;  %v345_v48 = vsub.f32 %v2571_v30, %v2985_v3  ;;  %v346_v0 = vsub.f32 %v2554_v21, %v2985_v3  ;;  %v433_v16 = vmul.f32 %v349_v51, %v349_v51  ;;  %v434_v8 = vmul.f32 %v350_v32, %v350_v32 }
  0xae   :  { %v347_v30 = vsub.f32 %v2578_v33, %v2987_v62  ;;  %v432_v17 = vmul.f32 %v348_v15, %v348_v15 }
  0xaf   :  { %v429_v42 = vmul.f32 %v345_v48, %v345_v48  ;;  %v430_v23 = vmul.f32 %v346_v0, %v346_v0  ;;  %v557_v39 = vsel %vm98_vm0, %v434_v8, 0.0 }
  0xb0   :  { %v194_v20 = vpop.xlane.xlu2 %193  ;;  %v558_v34 = vadd.f32 %v557_v39, %v433_v16  ;;  %v431_v33 = vmul.f32 %v347_v30, %v347_v30  ;;  %v553_v43 = vsel %vm98_vm0, %v432_v17, 0.0  ;;  %v5210_v16 = vld [vmem:[#allocation6_spill] sm:$0xff] }
  0xb1   :  { %v549_v58 = vsel %vm98_vm0, %v430_v23, 0.0  ;;  %v3004_v21 = vmul.f32 0.0051020407, %v194_v20  ;;  %v190_v41 = vpop.xlane.xlu1 %189  ;;  %v5212_v23 = vld [vmem:[#allocation7_spill] sm:$0xff]  ;;  %v5213_v20 = vld [vmem:[#allocation4_spill] sm:$0xff] }
  0xb2   :  { %v186_v55 = vpop.xlane.xlu0 %185  ;;  %v550_v27 = vadd.f32 %v549_v58, %v429_v42  ;;  %v3008_v22 = vmul.f32 0.0051020407, %v190_v41  ;;  %v554_v18 = vadd.f32 %v553_v43, %v431_v33 }
  0xb3   :  { %5203 = vst [vmem:[#allocation50_spill] sm:$0xff] %v3004_v21  ;;  %v3006_v24 = vmul.f32 0.0051020407, %v186_v55  ;;  %559 = vadd.xlane.f32.xlu2 %v558_v34  ;;  %v355_v56 = vsub.f32 %v2603_v47, %v3004_v21  ;;  %v356_v12 = vsub.f32 %v2588_v44, %v3004_v21  ;;  %v5214_v55 = vld [vmem:[#allocation5_spill] sm:$0xff] }
  0xb4   :  { %5205 = vst [vmem:[#allocation52_spill] sm:$0xff] %v3008_v22  ;;  %551 = vadd.xlane.f32.xlu0 %v550_v27  ;;  %543 = vadd.xlane.f32.xlu1 %v542_v10  ;;  %v354_v14 = vsub.f32 %v2598_v46, %v3008_v22 }
  0xb5   :  { %5204 = vst [vmem:[#allocation51_spill] sm:$0xff] %v3006_v24  ;;  %v351_v29 = vsub.f32 %v2610_v54, %v3006_v24  ;;  %v352_v63 = vsub.f32 %v2593_v45, %v3006_v24  ;;  %v439_v19 = vmul.f32 %v355_v56, %v355_v56  ;;  %v440_v60 = vmul.f32 %v356_v12, %v356_v12  ;;  %v5206_v54 = vld [vmem:[#allocation2_spill] sm:$0xff] }
  0xb6   :  { %v353_v31 = vsub.f32 %v5206_v54, %v3008_v22  ;;  %v438_v48 = vmul.f32 %v354_v14, %v354_v14  ;;  %v5220_v54 = vld [vmem:[#allocation9_spill] sm:$0xff] }
  0xb7   :  { %v435_v4 = vmul.f32 %v351_v29, %v351_v29  ;;  %v436_v47 = vmul.f32 %v352_v63, %v352_v63  ;;  %v569_v7 = vsel %vm98_vm0, %v440_v60, 0.0 }
  0xb8   :  { %v206_v44 = vpop.xlane.xlu2 %205  ;;  %v570_v5 = vadd.f32 %v569_v7, %v439_v19  ;;  %v437_v42 = vmul.f32 %v353_v31, %v353_v31  ;;  %v565_v30 = vsel %vm98_vm0, %v438_v48, 0.0  ;;  %v5215_v19 = vld [vmem:[#allocation8_spill] sm:$0xff]  ;;  %v5222_v48 = vld [vmem:[#allocation10_spill] sm:$0xff] }
  0xb9   :  { %v561_v28 = vsel %vm98_vm0, %v436_v47, 0.0  ;;  %v3025_v45 = vmul.f32 0.0051020407, %v206_v44  ;;  %v202_v9 = vpop.xlane.xlu1 %201 }
  0xba   :  { %v198_v51 = vpop.xlane.xlu0 %197  ;;  %v562_v32 = vadd.f32 %v561_v28, %v435_v4  ;;  %v3029_v46 = vmul.f32 0.0051020407, %v202_v9  ;;  %v566_v29 = vadd.f32 %v565_v30, %v437_v42  ;;  %v5223_v42 = vld [vmem:[#allocation11_spill] sm:$0xff] }
  0xbb   :  { %5207 = vst [vmem:[#allocation2_spill] sm:$0xff] %v3025_v45  ;;  %v3027_v0 = vmul.f32 0.0051020407, %v198_v51  ;;  %571 = vadd.xlane.f32.xlu2 %v570_v5  ;;  %v361_v8 = vsub.f32 %v5210_v16, %v3025_v45  ;;  %v362_v15 = vsub.f32 %v5211_v53, %v3025_v45  ;;  %v1156_v45 = vld [vmem:[%s5068_s1 + $0x38] sm:$0xff] }
  0xbc   :  { %5209 = vst [vmem:[#allocation54_spill] sm:$0xff] %v3029_v46  ;;  %563 = vadd.xlane.f32.xlu0 %v562_v32  ;;  %555 = vadd.xlane.f32.xlu1 %v554_v18  ;;  %v360_v27 = vsub.f32 %v5214_v55, %v3029_v46  ;;  %v359_v60 = vsub.f32 %v5215_v19, %v3029_v46  ;;  %v5219_v18 = vld [vmem:[#allocation12_spill] sm:$0xff]  ;;  %v5221_v32 = vld [vmem:[#allocation13_spill] sm:$0xff] }
  0xbd   :  { %5208 = vst [vmem:[#allocation53_spill] sm:$0xff] %v3027_v0  ;;  %v357_v39 = vsub.f32 %v5212_v23, %v3027_v0  ;;  %v358_v34 = vsub.f32 %v5213_v20, %v3027_v0  ;;  %v445_v10 = vmul.f32 %v361_v8, %v361_v8  ;;  %v446_v58 = vmul.f32 %v362_v15, %v362_v15 }
  0xbe   :  { %v444_v7 = vmul.f32 %v360_v27, %v360_v27  ;;  %v443_v51 = vmul.f32 %v359_v60, %v359_v60  ;;  %v5224_v27 = vld [vmem:[#allocation14_spill] sm:$0xff] }
  0xbf   :  { %v441_v41 = vmul.f32 %v357_v39, %v357_v39  ;;  %v442_v17 = vmul.f32 %v358_v34, %v358_v34  ;;  %v581_v56 = vsel %vm98_vm0, %v446_v58, 0.0  ;;  %v5228_v60 = vld [vmem:[#allocation18_spill] sm:$0xff] }
  0xc0   :  { %v218_v12 = vpop.xlane.xlu2 %217  ;;  %v582_v33 = vadd.f32 %v581_v56, %v445_v10  ;;  %v577_v15 = vsel %vm98_vm0, %v444_v7, 0.0 }
  0xc1   :  { %v573_v63 = vsel %vm98_vm0, %v442_v17, 0.0  ;;  %v3046_v43 = vmul.f32 0.0051020407, %v218_v12  ;;  %v214_v47 = vpop.xlane.xlu1 %213  ;;  %v578_v30 = vadd.f32 %v577_v15, %v443_v51 }
  0xc2   :  { %v210_v14 = vpop.xlane.xlu0 %209  ;;  %v574_v4 = vadd.f32 %v573_v63, %v441_v41  ;;  %v3050_v5 = vmul.f32 0.0051020407, %v214_v47 }
  0xc3   :  { %5216 = vst [vmem:[#allocation6_spill] sm:$0xff] %v3046_v43  ;;  %v3048_v44 = vmul.f32 0.0051020407, %v210_v14  ;;  %583 = vadd.xlane.f32.xlu2 %v582_v33  ;;  %v367_v28 = vsub.f32 %v5219_v18, %v3046_v43  ;;  %v368_v31 = vsub.f32 %v5220_v54, %v3046_v43  ;;  %v5230_v18 = vld [vmem:[#allocation19_spill] sm:$0xff]  ;;  %v5231_v54 = vld [vmem:[#allocation16_spill] sm:$0xff] }
  0xc4   :  { %5218 = vst [vmem:[#allocation7_spill] sm:$0xff] %v3050_v5  ;;  %575 = vadd.xlane.f32.xlu0 %v574_v4  ;;  %567 = vadd.xlane.f32.xlu1 %v566_v29  ;;  %v366_v23 = vsub.f32 %v5223_v42, %v3050_v5  ;;  %v365_v41 = vsub.f32 %v5224_v27, %v3050_v5  ;;  %v5229_v4 = vld [vmem:[#allocation15_spill] sm:$0xff] }
  0xc5   :  { %5217 = vst [vmem:[#allocation3_spill] sm:$0xff] %v3048_v44  ;;  %v363_v9 = vsub.f32 %v5221_v32, %v3048_v44  ;;  %v364_v16 = vsub.f32 %v5222_v48, %v3048_v44  ;;  %v451_v8 = vmul.f32 %v367_v28, %v367_v28  ;;  %v452_v53 = vmul.f32 %v368_v31, %v368_v31  ;;  %v5232_v48 = vld [vmem:[#allocation17_spill] sm:$0xff] }
  0xc6   :  { %v450_v29 = vmul.f32 %v366_v23, %v366_v23  ;;  %v449_v7 = vmul.f32 %v365_v41, %v365_v41 }
  0xc7   :  { %v447_v39 = vmul.f32 %v363_v9, %v363_v9  ;;  %v448_v20 = vmul.f32 %v364_v16, %v364_v16  ;;  %v593_v34 = vsel %vm98_vm0, %v452_v53, 0.0 }
  0xc8   :  { %v230_v10 = vpop.xlane.xlu2 %229  ;;  %v594_v58 = vadd.f32 %v593_v34, %v451_v8  ;;  %v589_v9 = vsel %vm98_vm0, %v450_v29, 0.0  ;;  %v5233_v34 = vld [vmem:[#allocation20_spill] sm:$0xff] }
  0xc9   :  { %v585_v55 = vsel %vm98_vm0, %v448_v20, 0.0  ;;  %v3067_v17 = vmul.f32 0.0051020407, %v230_v10  ;;  %v226_v33 = vpop.xlane.xlu1 %225 }
  0xca   :  { %v222_v56 = vpop.xlane.xlu0 %221  ;;  %v586_v12 = vadd.f32 %v585_v55, %v447_v39  ;;  %v3071_v19 = vmul.f32 0.0051020407, %v226_v33  ;;  %v590_v39 = vadd.f32 %v589_v9, %v449_v7  ;;  %v5237_v33 = vld [vmem:[#allocation24_spill] sm:$0xff] }
  0xcb   :  { %5225 = vst [vmem:[#allocation4_spill] sm:$0xff] %v3067_v17  ;;  %v3069_v63 = vmul.f32 0.0051020407, %v222_v56  ;;  %595 = vadd.xlane.f32.xlu2 %v594_v58  ;;  %v373_v14 = vsub.f32 %v5228_v60, %v3067_v17  ;;  %v374_v47 = vsub.f32 %v5229_v4, %v3067_v17  ;;  %v5238_v60 = vld [vmem:[#allocation21_spill] sm:$0xff]  ;;  %v1153_v17 = vld [vmem:[%s5068_s1 + $0x20] sm:$0xff] }
  0xcc   :  { %5227 = vst [vmem:[#allocation8_spill] sm:$0xff] %v3071_v19  ;;  %587 = vadd.xlane.f32.xlu0 %v586_v12  ;;  %579 = vadd.xlane.f32.xlu1 %v578_v30  ;;  %v372_v16 = vsub.f32 %v5232_v48, %v3071_v19  ;;  %v371_v10 = vsub.f32 %v5233_v34, %v3071_v19 }
  0xcd   :  { %5226 = vst [vmem:[#allocation5_spill] sm:$0xff] %v3069_v63  ;;  %v369_v28 = vsub.f32 %v5230_v18, %v3069_v63  ;;  %v370_v31 = vsub.f32 %v5231_v54, %v3069_v63  ;;  %v457_v51 = vmul.f32 %v373_v14, %v373_v14  ;;  %v458_v32 = vmul.f32 %v374_v47, %v374_v47  ;;  %v5239_v47 = vld [vmem:[#allocation25_spill] sm:$0xff]  ;;  %v5240_v18 = vld [vmem:[#allocation22_spill] sm:$0xff] }
  0xce   :  { %v456_v41 = vmul.f32 %v372_v16, %v372_v16  ;;  %v455_v4 = vmul.f32 %v371_v10, %v371_v10 }
  0xcf   :  { %v453_v8 = vmul.f32 %v369_v28, %v369_v28  ;;  %v454_v53 = vmul.f32 %v370_v31, %v370_v31  ;;  %v605_v15 = vsel %vm98_vm0, %v458_v32, 0.0  ;;  %v5241_v32 = vld [vmem:[#allocation23_spill] sm:$0xff] }
  0xd0   :  { %v242_v42 = vpop.xlane.xlu2 %241  ;;  %v606_v23 = vadd.f32 %v605_v15, %v457_v51  ;;  %v601_v51 = vsel %vm98_vm0, %v456_v41, 0.0 }
  0xd1   :  { %v597_v20 = vsel %vm98_vm0, %v454_v53, 0.0  ;;  %v3088_v58 = vmul.f32 0.0051020407, %v242_v42  ;;  %v238_v27 = vpop.xlane.xlu1 %237  ;;  %v602_v42 = vadd.f32 %v601_v51, %v455_v4 }
  0xd2   :  { %v234_v30 = vpop.xlane.xlu0 %233  ;;  %v598_v55 = vadd.f32 %v597_v20, %v453_v8  ;;  %v3092_v12 = vmul.f32 0.0051020407, %v238_v27 }
  0xd3   :  { %5234 = vst [vmem:[#allocation12_spill] sm:$0xff] %v3088_v58  ;;  %v3090_v56 = vmul.f32 0.0051020407, %v234_v30  ;;  %607 = vadd.xlane.f32.xlu2 %v606_v23  ;;  %v379_v29 = vsub.f32 %v5237_v33, %v3088_v58  ;;  %v380_v14 = vsub.f32 %v5238_v60, %v3088_v58 }
  0xd4   :  { %5236 = vst [vmem:[#allocation13_spill] sm:$0xff] %v3092_v12  ;;  %599 = vadd.xlane.f32.xlu0 %v598_v55  ;;  %591 = vadd.xlane.f32.xlu1 %v590_v39  ;;  %v378_v9 = vsub.f32 %v5241_v32, %v3092_v12  ;;  %v5242_v39 = vld [vmem:[#allocation26_spill] sm:$0xff] }
  0xd5   :  { %5235 = vst [vmem:[#allocation9_spill] sm:$0xff] %v3090_v56  ;;  %v375_v7 = vsub.f32 %v5239_v47, %v3090_v56  ;;  %v376_v28 = vsub.f32 %v5240_v18, %v3090_v56  ;;  %v463_v54 = vmul.f32 %v379_v29, %v379_v29  ;;  %v464_v31 = vmul.f32 %v380_v14, %v380_v14  ;;  %v5246_v29 = vld [vmem:[#allocation30_spill] sm:$0xff]  ;;  %v5247_v14 = vld [vmem:[#allocation27_spill] sm:$0xff] }
  0xd6   :  { %v377_v20 = vsub.f32 %v5242_v39, %v3092_v12  ;;  %v462_v27 = vmul.f32 %v378_v9, %v378_v9  ;;  %v5250_v9 = vld [vmem:[#allocation29_spill] sm:$0xff] }
  0xd7   :  { %v459_v48 = vmul.f32 %v375_v7, %v375_v7  ;;  %v460_v16 = vmul.f32 %v376_v28, %v376_v28  ;;  %v617_v8 = vsel %vm98_vm0, %v464_v31, 0.0  ;;  %v5248_v7 = vld [vmem:[#allocation31_spill] sm:$0xff]  ;;  %v5249_v28 = vld [vmem:[#allocation28_spill] sm:$0xff] }
  0xd8   :  { %v254_v53 = vpop.xlane.xlu2 %253  ;;  %v618_v15 = vadd.f32 %v617_v8, %v463_v54  ;;  %v461_v47 = vmul.f32 %v377_v20, %v377_v20  ;;  %v613_v32 = vsel %vm98_vm0, %v462_v27, 0.0  ;;  %v5251_v20 = vld [vmem:[#allocation32_spill] sm:$0xff] }
  0xd9   :  { %v609_v23 = vsel %vm98_vm0, %v460_v16, 0.0  ;;  %v3109_v34 = vmul.f32 0.0051020407, %v254_v53  ;;  %v250_v55 = vpop.xlane.xlu1 %249 }
  0xda   :  { %v246_v10 = vpop.xlane.xlu0 %245  ;;  %v610_v30 = vadd.f32 %v609_v23, %v459_v48  ;;  %v3113_v33 = vmul.f32 0.0051020407, %v250_v55  ;;  %v614_v23 = vadd.f32 %v613_v32, %v461_v47  ;;  %v5258_v32 = vld [vmem:[#allocation34_spill] sm:$0xff] }
  0xdb   :  { %5243 = vst [vmem:[#allocation10_spill] sm:$0xff] %v3109_v34  ;;  %v3111_v41 = vmul.f32 0.0051020407, %v246_v10  ;;  %619 = vadd.xlane.f32.xlu2 %v618_v15  ;;  %v385_v60 = vsub.f32 %v5246_v29, %v3109_v34  ;;  %v386_v4 = vsub.f32 %v5247_v14, %v3109_v34 }
  0xdc   :  { %5245 = vst [vmem:[#allocation14_spill] sm:$0xff] %v3113_v33  ;;  %611 = vadd.xlane.f32.xlu0 %v610_v30  ;;  %603 = vadd.xlane.f32.xlu1 %v602_v42  ;;  %v384_v48 = vsub.f32 %v5250_v9, %v3113_v33  ;;  %v383_v10 = vsub.f32 %v5251_v20, %v3113_v33 }
  0xdd   :  { %5244 = vst [vmem:[#allocation11_spill] sm:$0xff] %v3111_v41  ;;  %v381_v18 = vsub.f32 %v5248_v7, %v3111_v41  ;;  %v382_v54 = vsub.f32 %v5249_v28, %v3111_v41  ;;  %v469_v31 = vmul.f32 %v385_v60, %v385_v60  ;;  %v470_v51 = vmul.f32 %v386_v4, %v386_v4  ;;  %v5255_v7 = vld [vmem:[#allocation36_spill] sm:$0xff] }
  0xde   :  { %v468_v60 = vmul.f32 %v384_v48, %v384_v48 }
  0xdf   :  { %v465_v16 = vmul.f32 %v381_v18, %v381_v18  ;;  %v466_v8 = vmul.f32 %v382_v54, %v382_v54  ;;  %v629_v53 = vsel %vm98_vm0, %v470_v51, 0.0  ;;  %v5256_v18 = vld [vmem:[#allocation33_spill] sm:$0xff]  ;;  %v467_v54 = vmul.f32 %v383_v10, %v383_v10 }
  0xe0   :  { %v266_v15 = vpop.xlane.xlu2 %265  ;;  %v630_v42 = vadd.f32 %v629_v53, %v469_v31  ;;  %v5257_v31 = vld [vmem:[#allocation37_spill] sm:$0xff]  ;;  %v5259_v53 = vld [vmem:[#allocation35_spill] sm:$0xff] }
  0xe1   :  { %v621_v39 = vsel %vm98_vm0, %v466_v8, 0.0  ;;  %v3130_v30 = vmul.f32 0.0051020407, %v266_v15  ;;  %v262_v27 = vpop.xlane.xlu1 %261  ;;  %v625_v8 = vsel %vm98_vm0, %v468_v60, 0.0 }
  0xe2   :  { %v258_v55 = vpop.xlane.xlu0 %257  ;;  %v622_v29 = vadd.f32 %v621_v39, %v465_v16  ;;  %v3134_v4 = vmul.f32 0.0051020407, %v262_v27 }
  0xe3   :  { %5252 = vst [vmem:[#allocation18_spill] sm:$0xff] %v3130_v30  ;;  %v3132_v14 = vmul.f32 0.0051020407, %v258_v55  ;;  %631 = vadd.xlane.f32.xlu2 %v630_v42  ;;  %v391_v47 = vsub.f32 %v5255_v7, %v3130_v30  ;;  %v392_v28 = vsub.f32 %v5256_v18, %v3130_v30 }
  0xe4   :  { %5254 = vst [vmem:[#allocation19_spill] sm:$0xff] %v3134_v4  ;;  %623 = vadd.xlane.f32.xlu0 %v622_v29  ;;  %615 = vadd.xlane.f32.xlu1 %v614_v23  ;;  %v390_v15 = vsub.f32 %v5259_v53, %v3134_v4  ;;  %v626_v23 = vadd.f32 %v625_v8, %v467_v54  ;;  %v5260_v29 = vld [vmem:[#allocation38_spill] sm:$0xff] }
  0xe5   :  { %5253 = vst [vmem:[#allocation15_spill] sm:$0xff] %v3132_v14  ;;  %v387_v51 = vsub.f32 %v5257_v31, %v3132_v14  ;;  %v388_v9 = vsub.f32 %v5258_v32, %v3132_v14  ;;  %v475_v48 = vmul.f32 %v391_v47, %v391_v47  ;;  %v476_v16 = vmul.f32 %v392_v28, %v392_v28 }
  0xe6   :  { %v389_v27 = vsub.f32 %v5260_v29, %v3134_v4  ;;  %v474_v18 = vmul.f32 %v390_v15, %v390_v15  ;;  %v2291_v31 = vmov 0   ;;  %v1149_v4 = vld [vmem:[%s5068_s1] sm:$0xff] }
  0xe7   :  { %v471_v42 = vmul.f32 %v387_v51, %v387_v51  ;;  %v472_v39 = vmul.f32 %v388_v9, %v388_v9  ;;  %v641_v20 = vsel %vm98_vm0, %v476_v16, 0.0  ;;  %2122 = vset.pattern.permute.xlu2 %v2291_v31  ;;  %2120 = vset.pattern.permute.xlu0 %v2291_v31 }
  0xe8   :  { %v642_v55 = vadd.f32 %v641_v20, %v475_v48  ;;  %v473_v60 = vmul.f32 %v389_v27, %v389_v27  ;;  %v637_v47 = vsel %vm98_vm0, %v474_v18, 0.0  ;;  %2121 = vset.pattern.permute.xlu1 %v2291_v31 }
  0xe9   :  { %v633_v10 = vsel %vm98_vm0, %v472_v39, 0.0 }
  0xea   :  { %v634_v7 = vadd.f32 %v633_v10, %v471_v42  ;;  %v638_v28 = vadd.f32 %v637_v47, %v473_v60 }
  0xeb   :  { %643 = vadd.xlane.f32.xlu2 %v642_v55 }
  0xec   :  { %635 = vadd.xlane.f32.xlu0 %v634_v7  ;;  %627 = vadd.xlane.f32.xlu1 %v626_v23 }
  0xf4   :  { %639 = vadd.xlane.f32.xlu1 %v638_v28 }
  0xf6   :  { %v488_v54 = vpop.xlane.xlu2 %487 }
  0xf7   :  { %v480_v51 = vpop.xlane.xlu0 %479  ;;  %v647_v32 = vmul.f32 0.0051020407, %v488_v54 }
  0xf8   :  { %v645_v9 = vmul.f32 0.0051020407, %v480_v51 }
  0xf9   :  { %v689_v48 = vadd.f32 1e-05, %v647_v32 }
  0xfa   :  { %v687_v16 = vadd.f32 1e-05, %v645_v9 }
  0xfb   :  { %2123 = vrsqrt.f32 %v689_v48  ;;  %vm755_vm1 = vweird.f32 %v689_v48 }
  0xfc   :  { %2125 = vrsqrt.f32 %v687_v16  ;;  %vm735_vm5 = vweird.f32 %v687_v16 }
  0xfe   :  { %v500_v8 = vpop.xlane.xlu2 %499 }
  0xff   :  { %v492_v53 = vpop.xlane.xlu0 %491  ;;  %v650_v15 = vmul.f32 0.0051020407, %v500_v8  ;;  %v484_v42 = vpop.xlane.xlu1 %483 }
 0x100   :  { %v648_v39 = vmul.f32 0.0051020407, %v492_v53  ;;  %v646_v20 = vmul.f32 0.0051020407, %v484_v42 }
 0x101   :  { %v2124_v55 = vpop.eup %2123  ;;  %v3156_v18 = vadd.f32 1e-05, %v650_v15 }
 0x102   :  { %v3152_v23 = vadd.f32 1e-05, %v648_v39  ;;  %v2126_v10 = vpop.eup %2125  ;;  %v750_v29 = vmul.f32 %v2124_v55, %v689_v48  ;;  %v3154_v27 = vadd.f32 1e-05, %v646_v20  ;;  %vm756_vm2 = vweird.f32 %v2124_v55 }
 0x103   :  { %v730_v7 = vmul.f32 %v2126_v10, %v687_v16  ;;  %vm736_vm3 = vweird.f32 %v2126_v10  ;;  %vm757_vm4 = vmor %vm755_vm1, %vm756_vm2  ;;  %vm785_vm1 = vweird.f32 %v3156_v18 }
 0x104   :  { %v751_v60 = vmul.f32 %v2124_v55, %v750_v29  ;;  %2127 = vrsqrt.f32 %v3154_v27  ;;  %vm737_vm6 = vmor %vm735_vm5, %vm736_vm3  ;;  %vm745_vm8 = vweird.f32 %v3154_v27  ;;  %vm765_vm10 = vweird.f32 %v3152_v23 }
 0x105   :  { %v731_v47 = vmul.f32 %v2126_v10, %v730_v7  ;;  %2129 = vrsqrt.f32 %v3152_v23 }
 0x106   :  { %v752_v28 = vmul.f32 0.5, %v751_v60  ;;  %v512_v31 = vpop.xlane.xlu2 %511  ;;  %2131 = vrsqrt.f32 %v3156_v18 }
 0x107   :  { %v504_v54 = vpop.xlane.xlu0 %503  ;;  %v732_v51 = vmul.f32 0.5, %v731_v47  ;;  %v496_v32 = vpop.xlane.xlu1 %495  ;;  %v653_v42 = vmul.f32 0.0051020407, %v512_v31 }
 0x108   :  { %v753_v9 = vsub.f32 1.5, %v752_v28  ;;  %v649_v8 = vmul.f32 0.0051020407, %v496_v32  ;;  %v651_v60 = vmul.f32 0.0051020407, %v504_v54  ;;  %v1151_v28 = vld [vmem:[%s5068_s1 + $0x10] sm:$0xff] }
 0x109   :  { %v733_v15 = vsub.f32 1.5, %v732_v51  ;;  %v3181_v32 = vadd.f32 1e-05, %v653_v42 }
 0x10a   :  { %v3161_v53 = vpop.eup %2127  ;;  %v3163_v39 = vadd.f32 1e-05, %v649_v8  ;;  %v754_v20 = vmul.f32 %v2124_v55, %v753_v9  ;;  %v3187_v48 = vadd.f32 1e-05, %v651_v60 }
 0x10b   :  { %v3165_v29 = vpop.eup %2129  ;;  %v740_v7 = vmul.f32 %v3161_v53, %v3154_v27  ;;  %v734_v30 = vmul.f32 %v2126_v10, %v733_v15  ;;  %vm746_vm7 = vweird.f32 %v3161_v53 }
 0x10c   :  { %v760_v47 = vmul.f32 %v3165_v29, %v3152_v23  ;;  %2133 = vrsqrt.f32 %v3163_v39  ;;  %v3175_v31 = vpop.eup %2131  ;;  %v758_v14 = vsel %vm757_vm4, %v2124_v55, %v754_v20  ;;  %vm747_vm9 = vmor %vm745_vm8, %vm746_vm7  ;;  %vm766_vm11 = vweird.f32 %v3165_v29 }
 0x10d   :  { %v741_v51 = vmul.f32 %v3161_v53, %v740_v7  ;;  %v3189_v34 = vmul.f32 %v1151_v28, %v758_v14  ;;  %v780_v42 = vmul.f32 %v3175_v31, %v3156_v18  ;;  %2135 = vrsqrt.f32 %v3181_v32  ;;  %vm767_vm14 = vmor %vm765_vm10, %vm766_vm11 }
 0x10e   :  { %v761_v54 = vmul.f32 %v3165_v29, %v760_v47  ;;  %v524_v9 = vpop.xlane.xlu2 %523  ;;  %v738_v47 = vsel %vm737_vm6, %v2126_v10, %v734_v30  ;;  %2137 = vrsqrt.f32 %v3187_v48  ;;  %vm775_vm12 = vweird.f32 %v3163_v39 }
 0x10f   :  { %v516_v8 = vpop.xlane.xlu0 %515  ;;  %v742_v41 = vmul.f32 0.5, %v741_v51  ;;  %v508_v16 = vpop.xlane.xlu1 %507  ;;  %v656_v33 = vmul.f32 0.0051020407, %v524_v9  ;;  %1371 = vperm.xlu2 %2122, %v3189_v34   ;;  %v3194_v55 = vmul.f32 %v1149_v4, %v738_v47  ;;  %v781_v30 = vmul.f32 %v3175_v31, %v780_v42 }
 0x110   :  { %v652_v7 = vmul.f32 0.0051020407, %v508_v16  ;;  %v762_v56 = vmul.f32 0.5, %v761_v54  ;;  %v654_v10 = vmul.f32 0.0051020407, %v516_v8  ;;  %v1150_v16 = vld [vmem:[%s5068_s1 + $0x8] sm:$0xff]  ;;  %vm786_vm2 = vweird.f32 %v3175_v31 }
 0x111   :  { %v743_v20 = vsub.f32 1.5, %v742_v41  ;;  %1361 = vperm.xlu0 %2120, %v3194_v55   ;;  %v3209_v4 = vadd.f32 1e-05, %v656_v33  ;;  %vm3283_vm3 = vmor %vm785_vm1, %vm786_vm2  ;;  %vm815_vm7 = vweird.f32 %v3181_v32 }
 0x112   :  { %v3196_v15 = vpop.eup %2133  ;;  %v3199_v60 = vadd.f32 1e-05, %v652_v7  ;;  %v763_v28 = vsub.f32 1.5, %v762_v56  ;;  %v3224_v8 = vadd.f32 1e-05, %v654_v10  ;;  %v1152_v10 = vld [vmem:[%s5068_s1 + $0x18] sm:$0xff] }
 0x113   :  { %v770_v14 = vmul.f32 %v3196_v15, %v3163_v39  ;;  %v744_v9 = vmul.f32 %v3161_v53, %v743_v20  ;;  %v3216_v47 = vpop.eup %2135  ;;  %vm776_vm13 = vweird.f32 %v3196_v15 }
 0x114   :  { %2139 = vrsqrt.f32 %v3199_v60  ;;  %v3220_v56 = vpop.eup %2137  ;;  %vm777_vm15 = vmor %vm775_vm12, %vm776_vm13  ;;  %vm805_vm5 = vweird.f32 %v3199_v60  ;;  %vm816_vm8 = vweird.f32 %v3216_v47  ;;  %vm845_vm12 = vweird.f32 %v3209_v4 }
 0x115   :  { %v771_v41 = vmul.f32 %v3196_v15, %v770_v14  ;;  %v782_v14 = vmul.f32 0.5, %v781_v30  ;;  %v748_v27 = vsel %vm747_vm9, %v3161_v53, %v744_v9  ;;  %2141 = vrsqrt.f32 %v3209_v4  ;;  %vm3345_vm11 = vmor %vm815_vm7, %vm816_vm8 }
 0x116   :  { %v536_v51 = vpop.xlane.xlu2 %535  ;;  %v3226_v20 = vmul.f32 %v1150_v16, %v748_v27  ;;  %vm795_vm9 = vweird.f32 %v3187_v48  ;;  %vm796_vm10 = vweird.f32 %v3220_v56  ;;  %vm825_vm13 = vweird.f32 %v3224_v8 }
 0x117   :  { %v528_v54 = vpop.xlane.xlu0 %527  ;;  %v772_v42 = vmul.f32 0.5, %v771_v41  ;;  %v520_v7 = vpop.xlane.xlu1 %519  ;;  %v659_v12 = vmul.f32 0.0051020407, %v536_v51  ;;  %v783_v9 = vsub.f32 1.5, %v782_v14  ;;  %v790_v51 = vmul.f32 %v3220_v56, %v3187_v48 }
 0x118   :  { %v655_v33 = vmul.f32 0.0051020407, %v520_v7  ;;  %v764_v7 = vmul.f32 %v3165_v29, %v763_v28  ;;  %1366 = vperm.xlu1 %2121, %v3226_v20   ;;  %v810_v28 = vmul.f32 %v3216_v47, %v3181_v32  ;;  %v1157_v32 = vld [vmem:[%s5068_s1 + $0x40] sm:$0xff] }
 0x119   :  { %v773_v58 = vsub.f32 1.5, %v772_v42  ;;  %v657_v42 = vmul.f32 0.0051020407, %v528_v54  ;;  %v3252_v14 = vadd.f32 1e-05, %v659_v12  ;;  %v791_v44 = vmul.f32 %v3220_v56, %v790_v51 }
 0x11a   :  { %v3228_v41 = vpop.eup %2139  ;;  %v3230_v30 = vadd.f32 1e-05, %v655_v33  ;;  %v768_v33 = vsel %vm767_vm14, %v3165_v29, %v764_v7  ;;  %v811_v7 = vmul.f32 %v3216_v47, %v810_v28  ;;  %vm797_vm14 = vmor %vm795_vm9, %vm796_vm10 }
 0x11b   :  { %v800_v53 = vmul.f32 %v3228_v41, %v3199_v60  ;;  %v774_v23 = vmul.f32 %v3196_v15, %v773_v58  ;;  %v3259_v19 = vpop.eup %2141  ;;  %v3265_v12 = vmul.f32 %v1152_v10, %v768_v33  ;;  %v3272_v43 = vadd.f32 1e-05, %v657_v42 }
 0x11c   :  { %2143 = vrsqrt.f32 %v3230_v30  ;;  %v784_v33 = vmul.f32 %v3175_v31, %v783_v9  ;;  %v840_v28 = vmul.f32 %v3259_v19, %v3209_v4  ;;  %vm806_vm4 = vweird.f32 %v3228_v41  ;;  %v1154_v9 = vld [vmem:[%s5068_s1 + $0x28] sm:$0xff] }
 0x11d   :  { %v801_v16 = vmul.f32 %v3228_v41, %v800_v53  ;;  %2145 = vrsqrt.f32 %v3224_v8  ;;  %v778_v29 = vsel %vm777_vm15, %v3196_v15, %v774_v23  ;;  %1376 = vperm.xlu2 %2122, %v3265_v12   ;;  %vm807_vm6 = vmor %vm805_vm5, %vm806_vm4  ;;  %vm846_vm1 = vweird.f32 %v3259_v19 }
 0x11e   :  { %v548_v27 = vpop.xlane.xlu2 %547  ;;  %v3275_v39 = vmul.f32 %v1153_v17, %v778_v29  ;;  %2147 = vrsqrt.f32 %v3252_v14  ;;  %v841_v60 = vmul.f32 %v3259_v19, %v840_v28  ;;  %vm835_vm4 = vweird.f32 %v3230_v30 }
 0x11f   :  { %v540_v63 = vpop.xlane.xlu0 %539  ;;  %v802_v54 = vmul.f32 0.5, %v801_v16  ;;  %v532_v53 = vpop.xlane.xlu1 %531  ;;  %v662_v23 = vmul.f32 0.0051020407, %v548_v27 }
 0x120   :  { %v658_v58 = vmul.f32 0.0051020407, %v532_v53  ;;  %1381 = vperm.xlu1 %2121, %v3275_v39   ;;  %v792_v53 = vmul.f32 0.5, %v791_v44 }
 0x121   :  { %v803_v16 = vsub.f32 1.5, %v802_v54  ;;  %v812_v54 = vmul.f32 0.5, %v811_v7  ;;  %v3320_v46 = vadd.f32 1e-05, %v662_v23 }
 0x122   :  { %v3277_v10 = vpop.eup %2143  ;;  %v3280_v18 = vadd.f32 1e-05, %v658_v58  ;;  %v788_v58 = vsel %vm3283_vm3, %v3175_v31, %v784_v33  ;;  %v660_v33 = vmul.f32 0.0051020407, %v540_v63  ;;  %vm875_vm3 = vweird.f32 %v3252_v14 }
 0x123   :  { %v830_v17 = vmul.f32 %v3277_v10, %v3230_v30  ;;  %v3292_v51 = vpop.eup %2145  ;;  %v804_v0 = vmul.f32 %v3228_v41, %v803_v16  ;;  %v3314_v27 = vmul.f32 %v1154_v9, %v788_v58  ;;  %v813_v9 = vsub.f32 1.5, %v812_v54  ;;  %v1159_v30 = vld [vmem:[%s5068_s1 + $0x50] sm:$0xff] }
 0x124   :  { %2149 = vrsqrt.f32 %v3280_v18  ;;  %v820_v44 = vmul.f32 %v3292_v51, %v3224_v8  ;;  %v3316_v31 = vpop.eup %2147  ;;  %v793_v58 = vsub.f32 1.5, %v792_v53  ;;  %v3340_v23 = vadd.f32 1e-05, %v660_v33 }
 0x125   :  { %v831_v42 = vmul.f32 %v3277_v10, %v830_v17  ;;  %2151 = vrsqrt.f32 %v3272_v43  ;;  %v808_v16 = vsel %vm807_vm6, %v3228_v41, %v804_v0  ;;  %1386 = vperm.xlu2 %2122, %v3314_v27   ;;  %v842_v0 = vmul.f32 0.5, %v841_v60  ;;  %vm3409_vm6 = vmor %vm845_vm12, %vm846_vm1 }
 0x126   :  { %v560_v29 = vpop.xlane.xlu2 %559  ;;  %v3323_v28 = vmul.f32 %v1156_v45, %v808_v16  ;;  %v821_v41 = vmul.f32 %v3292_v51, %v820_v44  ;;  %v794_v33 = vmul.f32 %v3220_v56, %v793_v58  ;;  %vm836_vm15 = vweird.f32 %v3277_v10 }
 0x127   :  { %v552_v5 = vpop.xlane.xlu0 %551  ;;  %v544_v7 = vpop.xlane.xlu1 %543  ;;  %v832_v17 = vmul.f32 0.5, %v831_v42  ;;  %v870_v42 = vmul.f32 %v3316_v31, %v3252_v14  ;;  %v665_v44 = vmul.f32 0.0051020407, %v560_v29  ;;  %v843_v29 = vsub.f32 1.5, %v842_v0  ;;  %vm3396_vm5 = vmor %vm835_vm4, %vm836_vm15 }
 0x128   :  { %v661_v15 = vmul.f32 0.0051020407, %v544_v7  ;;  %1396 = vperm.xlu0 %2120, %v3323_v28   ;;  %v814_v7 = vmul.f32 %v3216_v47, %v813_v9  ;;  %v822_v22 = vmul.f32 0.5, %v821_v41  ;;  %v798_v62 = vsel %vm797_vm14, %v3220_v56, %v794_v33 }
 0x129   :  { %v833_v53 = vsub.f32 1.5, %v832_v17  ;;  %v871_v9 = vmul.f32 %v3316_v31, %v870_v42  ;;  %v663_v36 = vmul.f32 0.0051020407, %v552_v5  ;;  %v3383_v49 = vadd.f32 1e-05, %v665_v44 }
 0x12a   :  { %v3325_v24 = vpop.eup %2149  ;;  %v3328_v21 = vadd.f32 1e-05, %v661_v15  ;;  %v1155_v15 = vld [vmem:[%s5068_s1 + $0x30] sm:$0xff]  ;;  %v818_v61 = vsel %vm3345_vm11, %v3216_v47, %v814_v7  ;;  %vm826_vm2 = vweird.f32 %v3292_v51  ;;  %vm876_vm7 = vweird.f32 %v3316_v31 }
 0x12b   :  { %v3330_v63 = vpop.eup %2151  ;;  %v860_v45 = vmul.f32 %v3325_v24, %v3280_v18  ;;  %v3374_v48 = vmul.f32 %v1157_v32, %v818_v61  ;;  %v3376_v0 = vmul.f32 %v1155_v15, %v798_v62  ;;  %v834_v41 = vmul.f32 %v3277_v10, %v833_v53  ;;  %vm827_vm8 = vmor %vm825_vm13, %vm826_vm2 }
 0x12c   :  { %2153 = vrsqrt.f32 %v3328_v21  ;;  %v850_v60 = vmul.f32 %v3330_v63, %v3272_v43  ;;  %v823_v62 = vsub.f32 1.5, %v822_v22  ;;  %v872_v5 = vmul.f32 0.5, %v871_v9  ;;  %vm3469_vm10 = vmor %vm875_vm3, %vm876_vm7 }
 0x12d   :  { %2155 = vrsqrt.f32 %v3320_v46  ;;  %v861_v58 = vmul.f32 %v3325_v24, %v860_v45  ;;  %1401 = vperm.xlu2 %2122, %v3374_v48   ;;  %1391 = vperm.xlu1 %2121, %v3376_v0   ;;  %v3414_v53 = vadd.f32 1e-05, %v663_v36  ;;  %v1160_v36 = vld [vmem:[%s5068_s1 + $0x58] sm:$0xff]  ;;  %vm866_vm9 = vweird.f32 %v3325_v24 }
 0x12e   :  { %v572_v16 = vpop.xlane.xlu2 %571  ;;  %2157 = vrsqrt.f32 %v3340_v23  ;;  %v851_v45 = vmul.f32 %v3330_v63, %v850_v60  ;;  %v844_v60 = vmul.f32 %v3259_v19, %v843_v29  ;;  %vm855_vm11 = vweird.f32 %v3272_v43 }
 0x12f   :  { %v564_v17 = vpop.xlane.xlu0 %563  ;;  %v556_v3 = vpop.xlane.xlu1 %555  ;;  %v862_v47 = vmul.f32 0.5, %v861_v58  ;;  %2159 = vrsqrt.f32 %v3383_v49  ;;  %v668_v32 = vmul.f32 0.0051020407, %v572_v16  ;;  %v873_v58 = vsub.f32 1.5, %v872_v5 }
 0x130   :  { %v664_v50 = vmul.f32 0.0051020407, %v556_v3  ;;  %v852_v7 = vmul.f32 0.5, %v851_v45  ;;  %v848_v45 = vsel %vm3409_vm6, %v3259_v19, %v844_v60  ;;  %v824_v16 = vmul.f32 %v3292_v51, %v823_v62  ;;  %v1158_v3 = vld [vmem:[%s5068_s1 + $0x48] sm:$0xff] }
 0x131   :  { %v3447_v19 = vmul.f32 %v1160_v36, %v848_v45  ;;  %vm865_vm12 = vweird.f32 %v3280_v18  ;;  %vm856_vm13 = vweird.f32 %v3330_v63  ;;  %v1163_v18 = vld [vmem:[%s5068_s1 + $0x70] sm:$0xff]  ;;  %vm905_vm2 = vweird.f32 %v3320_v46 }
 0x132   :  { %v3379_v42 = vpop.eup %2153  ;;  %v3400_v56 = vadd.f32 1e-05, %v664_v50  ;;  %v838_v50 = vsel %vm3396_vm5, %v3277_v10, %v834_v41  ;;  %v666_v10 = vmul.f32 0.0051020407, %v564_v17  ;;  %v863_v41 = vsub.f32 1.5, %v862_v47  ;;  %vm867_vm14 = vmor %vm865_vm12, %vm866_vm9 }
 0x133   :  { %v3385_v54 = vpop.eup %2155  ;;  %v890_v61 = vmul.f32 %v3379_v42, %v3328_v21  ;;  %v3430_v29 = vmul.f32 %v1159_v30, %v838_v50  ;;  %5269 = vst [vmem:[#allocation16_spill] sm:$0xff] %v3447_v19  ;;  %v853_v62 = vsub.f32 1.5, %v852_v7  ;;  %v3450_v47 = vadd.f32 1e-05, %v668_v32  ;;  %vm857_vm15 = vmor %vm855_vm11, %vm856_vm13 }
 0x134   :  { %v3420_v44 = vpop.eup %2157  ;;  %v900_v4 = vmul.f32 %v3385_v54, %v3320_v46  ;;  %2161 = vrsqrt.f32 %v3400_v56  ;;  %v828_v30 = vsel %vm827_vm8, %v3292_v51, %v824_v16  ;;  %v3454_v22 = vadd.f32 1e-05, %v666_v10  ;;  %v1162_v10 = vld [vmem:[%s5068_s1 + $0x68] sm:$0xff] }
 0x135   :  { %v891_v15 = vmul.f32 %v3379_v42, %v890_v61  ;;  %v880_v17 = vmul.f32 %v3420_v44, %v3340_v23  ;;  %2163 = vrsqrt.f32 %v3414_v53  ;;  %1411 = vperm.xlu0 %2120, %v3430_v29   ;;  %1416 = vperm.xlu2 %2122, %v3447_v19   ;;  %v3457_v50 = vmul.f32 %v1158_v3, %v828_v30  ;;  %v3459_v60 = vpop.eup %2159  ;;  %v1166_v46 = vld [vmem:[%s5068_s1 + $0x88] sm:$0xff] }
 0x136   :  { %v584_v33 = vpop.xlane.xlu2 %583  ;;  %v901_v5 = vmul.f32 %v3385_v54, %v900_v4  ;;  %v864_v7 = vmul.f32 %v3325_v24, %v863_v41  ;;  %v874_v4 = vmul.f32 %v3316_v31, %v873_v58  ;;  %2165 = vrsqrt.f32 %v3450_v47 }
 0x137   :  { %v568_v9 = vpop.xlane.xlu1 %567  ;;  %v576_v13 = vpop.xlane.xlu0 %575  ;;  %v892_v8 = vmul.f32 0.5, %v891_v15  ;;  %5270 = vst [vmem:[#allocation17_spill] sm:$0xff] %v3457_v50  ;;  %v671_v36 = vmul.f32 0.0051020407, %v584_v33  ;;  %v881_v33 = vmul.f32 %v3420_v44, %v880_v17  ;;  %1406 = vperm.xlu1 %2121, %v3457_v50   ;;  %v930_v45 = vmul.f32 %v3459_v60, %v3383_v49 }
 0x138   :  { %v667_v61 = vmul.f32 0.0051020407, %v568_v9  ;;  %v3483_v14 = vmul.f32 0.5, %v901_v5  ;;  %v854_v9 = vmul.f32 %v3330_v63, %v853_v62  ;;  %2167 = vrsqrt.f32 %v3454_v22 }
 0x139   :  { %v893_v16 = vsub.f32 1.5, %v892_v8  ;;  %v868_v3 = vsel %vm867_vm14, %v3325_v24, %v864_v7  ;;  %v3500_v5 = vadd.f32 1e-05, %v671_v36  ;;  %v878_v62 = vsel %vm3469_vm10, %v3316_v31, %v874_v4  ;;  %v1161_v8 = vld [vmem:[%s5068_s1 + $0x60] sm:$0xff] }
 0x13a   :  { %v3463_v32 = vpop.eup %2161  ;;  %v3477_v15 = vadd.f32 1e-05, %v667_v61  ;;  %v3502_v30 = vmul.f32 %v1162_v10, %v868_v3  ;;  %v882_v24 = vmul.f32 0.5, %v881_v33  ;;  %vm896_vm1 = vweird.f32 %v3379_v42 }
 0x13b   :  { %v3492_v41 = vpop.eup %2163  ;;  %v920_v61 = vmul.f32 %v3463_v32, %v3400_v56  ;;  %v3516_v36 = vmul.f32 %v1163_v18, %v878_v62  ;;  %v669_v31 = vmul.f32 0.0051020407, %v576_v13  ;;  %v858_v4 = vsel %vm857_vm15, %v3330_v63, %v854_v9  ;;  %v1165_v62 = vld [vmem:[%s5068_s1 + $0x80] sm:$0xff] }
 0x13c   :  { %5273 = vst [vmem:[#allocation20_spill] sm:$0xff] %v3502_v30  ;;  %2169 = vrsqrt.f32 %v3477_v15  ;;  %v910_v7 = vmul.f32 %v3492_v41, %v3414_v53  ;;  %v3524_v43 = vmul.f32 %v1161_v8, %v858_v4  ;;  %v894_v33 = vmul.f32 %v3379_v42, %v893_v16  ;;  %v3527_v18 = vpop.eup %2165 }
 0x13d   :  { %5274 = vst [vmem:[#allocation24_spill] sm:$0xff] %v3516_v36  ;;  %1426 = vperm.xlu0 %2120, %v3502_v30   ;;  %1431 = vperm.xlu2 %2122, %v3516_v36   ;;  %v931_v3 = vmul.f32 %v3459_v60, %v930_v45  ;;  %vm895_vm3 = vweird.f32 %v3328_v21  ;;  %v921_v13 = vmul.f32 %v3463_v32, %v920_v61  ;;  %2171 = vrsqrt.f32 %v3500_v5 }
 0x13e   :  { %v596_v58 = vpop.xlane.xlu2 %595  ;;  %5275 = vst [vmem:[#allocation21_spill] sm:$0xff] %v3524_v43  ;;  %v3533_v63 = vpop.eup %2167  ;;  %v903_v9 = vsub.f32 1.5, %v3483_v14  ;;  %vm906_vm4 = vweird.f32 %v3385_v54  ;;  %vm3539_vm5 = vmor %vm895_vm3, %vm896_vm1  ;;  %v911_v45 = vmul.f32 %v3492_v41, %v910_v7  ;;  %v3547_v61 = vadd.f32 1e-05, %v669_v31 }
 0x13f   :  { %v580_v17 = vpop.xlane.xlu1 %579  ;;  %v588_v10 = vpop.xlane.xlu0 %587  ;;  %1421 = vperm.xlu1 %2121, %v3524_v43   ;;  %v898_v14 = vsel %vm3539_vm5, %v3379_v42, %v894_v33  ;;  %vm885_vm6 = vweird.f32 %v3340_v23  ;;  %vm886_vm7 = vweird.f32 %v3420_v44  ;;  %vm935_vm8 = vweird.f32 %v3383_v49  ;;  %vm3566_vm9 = vmor %vm905_vm2, %vm906_vm4 }
 0x140   :  { %v670_v51 = vmul.f32 0.0051020407, %v580_v17  ;;  %v883_v17 = vsub.f32 1.5, %v882_v24  ;;  %v960_v24 = vmul.f32 %v3527_v18, %v3450_v47  ;;  %v932_v31 = vmul.f32 0.5, %v931_v3  ;;  %v1164_v3 = vld [vmem:[%s5068_s1 + $0x78] sm:$0xff]  ;;  %vm887_vm10 = vmor %vm885_vm6, %vm886_vm7 }
 0x141   :  { %v922_v4 = vmul.f32 0.5, %v921_v13  ;;  %v674_v33 = vmul.f32 0.0051020407, %v596_v58  ;;  %v3573_v43 = vmul.f32 %v1165_v62, %v898_v14  ;;  %v904_v36 = vmul.f32 %v3385_v54, %v903_v9 }
 0x142   :  { %v3544_v21 = vadd.f32 1e-05, %v670_v51  ;;  %v3555_v8 = vpop.eup %2169  ;;  %v940_v51 = vmul.f32 %v3533_v63, %v3454_v22  ;;  %v884_v37 = vmul.f32 %v3420_v44, %v883_v17  ;;  %v912_v58 = vmul.f32 0.5, %v911_v45 }
 0x143   :  { %5280 = vst [vmem:[#allocation25_spill] sm:$0xff] %v3573_v43  ;;  %v3583_v13 = vpop.eup %2171  ;;  %v950_v9 = vmul.f32 %v3555_v8, %v3477_v15  ;;  %vm915_vm11 = vweird.f32 %v3414_v53  ;;  %v961_v17 = vmul.f32 %v3527_v18, %v960_v24  ;;  %v908_v62 = vsel %vm3566_vm9, %v3385_v54, %v904_v36 }
 0x144   :  { %2173 = vrsqrt.f32 %v3544_v21  ;;  %v888_v23 = vsel %vm887_vm10, %v3420_v44, %v884_v37  ;;  %v923_v30 = vsub.f32 1.5, %v922_v4  ;;  %v941_v45 = vmul.f32 %v3533_v63, %v940_v51 }
 0x145   :  { %2175 = vrsqrt.f32 %v3547_v61  ;;  %1441 = vperm.xlu0 %2120, %v3573_v43   ;;  %v3600_v38 = vmul.f32 %v1166_v46, %v908_v62  ;;  %v3602_v50 = vmul.f32 %v1164_v3, %v888_v23  ;;  %v990_v1 = vmul.f32 %v3583_v13, %v3500_v5 }
 0x146   :  { %v608_v16 = vpop.xlane.xlu2 %607  ;;  %v3606_v24 = vadd.f32 1e-05, %v674_v33  ;;  %v672_v43 = vmul.f32 0.0051020407, %v588_v10  ;;  %v933_v42 = vsub.f32 1.5, %v932_v31  ;;  %vm936_vm12 = vweird.f32 %v3459_v60 }
 0x147   :  { %v592_v7 = vpop.xlane.xlu1 %591  ;;  %5281 = vst [vmem:[#allocation22_spill] sm:$0xff] %v3602_v50  ;;  %v913_v37 = vsub.f32 1.5, %v912_v58  ;;  %v951_v54 = vmul.f32 %v3555_v8, %v950_v9  ;;  %1446 = vperm.xlu2 %2122, %v3600_v38   ;;  %1436 = vperm.xlu1 %2121, %v3602_v50   ;;  %vm916_vm13 = vweird.f32 %v3492_v41  ;;  %vm965_vm14 = vweird.f32 %v3450_v47  ;;  %vm3629_vm2 = vmor %vm935_vm8, %vm936_vm12  ;;  %v1172_v47 = vld [vmem:[%s5068_s1 + $0xb8] sm:$0xff] }
 0x148   :  { %v673_v14 = vmul.f32 0.0051020407, %v592_v7  ;;  %v600_v7 = vpop.xlane.xlu0 %599  ;;  %vm925_vm15 = vweird.f32 %v3400_v56  ;;  %vm926_vm1 = vweird.f32 %v3463_v32  ;;  %v962_v31 = vmul.f32 0.5, %v961_v17  ;;  %vm3652_vm4 = vmor %vm915_vm11, %vm916_vm13 }
 0x149   :  { %v3622_v4 = vmul.f32 0.5, %v941_v45  ;;  %v677_v51 = vmul.f32 0.0051020407, %v608_v16  ;;  %v991_v56 = vmul.f32 %v3583_v13, %v990_v1  ;;  %v3635_v46 = vadd.f32 1e-05, %v672_v43  ;;  %v1168_v16 = vld [vmem:[%s5068_s1 + $0x98] sm:$0xff]  ;;  %vm927_vm3 = vmor %vm925_vm15, %vm926_vm1 }
 0x14a   :  { %v3608_v19 = vadd.f32 1e-05, %v673_v14  ;;  %v3614_v44 = vpop.eup %2173  ;;  %v924_v3 = vmul.f32 %v3463_v32, %v923_v30  ;;  %v952_v58 = vmul.f32 0.5, %v951_v54  ;;  %v934_v9 = vmul.f32 %v3459_v60, %v933_v42  ;;  %v1169_v1 = vld [vmem:[%s5068_s1 + $0xa0] sm:$0xff]  ;;  %v1167_v45 = vld [vmem:[%s5068_s1 + $0x90] sm:$0xff] }
 0x14b   :  { %v3620_v10 = vpop.eup %2175  ;;  %v980_v49 = vmul.f32 %v3614_v44, %v3544_v21  ;;  %v914_v43 = vmul.f32 %v3492_v41, %v913_v37  ;;  %v675_v62 = vmul.f32 0.0051020407, %v600_v7  ;;  %v3662_v37 = vadd.f32 1e-05, %v677_v51 }
 0x14c   :  { %2177 = vrsqrt.f32 %v3608_v19  ;;  %v970_v17 = vmul.f32 %v3620_v10, %v3547_v61  ;;  %v928_v23 = vsel %vm927_vm3, %v3463_v32, %v924_v3  ;;  %v938_v53 = vsel %vm3629_vm2, %v3459_v60, %v934_v9 }
 0x14d   :  { %2179 = vrsqrt.f32 %v3606_v24  ;;  %v3664_v54 = vmul.f32 %v1168_v16, %v928_v23  ;;  %v918_v50 = vsel %vm3652_vm4, %v3492_v41, %v914_v43  ;;  %v963_v7 = vsub.f32 1.5, %v962_v31 }
 0x14e   :  { %v620_v14 = vpop.xlane.xlu2 %619  ;;  %vm945_vm5 = vweird.f32 %v3454_v22  ;;  %2181 = vrsqrt.f32 %v3635_v46  ;;  %v3674_v32 = vmul.f32 %v1169_v1, %v938_v53  ;;  %v953_v51 = vsub.f32 1.5, %v952_v58 }
 0x14f   :  { %v604_v36 = vpop.xlane.xlu1 %603  ;;  %5286 = vst [vmem:[#allocation23_spill] sm:$0xff] %v3664_v54  ;;  %v981_v3 = vmul.f32 %v3614_v44, %v980_v49  ;;  %1456 = vperm.xlu0 %2120, %v3664_v54   ;;  %v3680_v33 = vmul.f32 %v1167_v45, %v918_v50  ;;  %vm966_vm6 = vweird.f32 %v3527_v18  ;;  %v943_v31 = vsub.f32 1.5, %v3622_v4 }
 0x150   :  { %v676_v42 = vmul.f32 0.0051020407, %v604_v36  ;;  %5287 = vst [vmem:[#allocation26_spill] sm:$0xff] %v3674_v32  ;;  %v612_v16 = vpop.xlane.xlu0 %611  ;;  %v3688_v9 = vmul.f32 0.5, %v991_v56  ;;  %v3690_v1 = vadd.f32 1e-05, %v675_v62  ;;  %1461 = vperm.xlu2 %2122, %v3674_v32   ;;  %vm956_vm7 = vweird.f32 %v3555_v8  ;;  %vm3706_vm10 = vmor %vm965_vm14, %vm966_vm6 }
 0x151   :  { %5288 = vst [vmem:[#allocation30_spill] sm:$0xff] %v3680_v33  ;;  %v971_v50 = vmul.f32 %v3620_v10, %v970_v17  ;;  %2183 = vrsqrt.f32 %v3662_v37  ;;  %1451 = vperm.xlu1 %2121, %v3680_v33   ;;  %v680_v58 = vmul.f32 0.0051020407, %v620_v14  ;;  %vm946_vm8 = vweird.f32 %v3533_v63 }
 0x152   :  { %v3676_v36 = vpop.eup %2177  ;;  %v3682_v60 = vadd.f32 1e-05, %v676_v42  ;;  %vm955_vm9 = vweird.f32 %v3477_v15  ;;  %v982_v43 = vmul.f32 0.5, %v981_v3  ;;  %v678_v14 = vmul.f32 0.0051020407, %v612_v16  ;;  %v1171_v15 = vld [vmem:[%s5068_s1 + $0xb0] sm:$0xff]  ;;  %vm947_vm13 = vmor %vm945_vm5, %vm946_vm8 }
 0x153   :  { %v3684_v41 = vpop.eup %2179  ;;  %v1010_v4 = vmul.f32 %v3676_v36, %v3608_v19  ;;  %v954_v30 = vmul.f32 %v3555_v8, %v953_v51  ;;  %v964_v17 = vmul.f32 %v3527_v18, %v963_v7  ;;  %v993_v23 = vsub.f32 1.5, %v3688_v9  ;;  %vm957_vm12 = vmor %vm955_vm9, %vm956_vm7  ;;  %v1170_v42 = vld [vmem:[%s5068_s1 + $0xa8] sm:$0xff] }
 0x154   :  { %2185 = vrsqrt.f32 %v3682_v60  ;;  %v3715_v62 = vpop.eup %2181  ;;  %vm995_vm11 = vweird.f32 %v3500_v5  ;;  %v944_v45 = vmul.f32 %v3533_v63, %v943_v31  ;;  %v972_v53 = vmul.f32 0.5, %v971_v50 }
 0x155   :  { %2187 = vrsqrt.f32 %v3690_v1  ;;  %v1020_v7 = vmul.f32 %v3684_v41, %v3606_v24  ;;  %v3735_v51 = vadd.f32 1e-05, %v680_v58  ;;  %v958_v3 = vsel %vm957_vm12, %v3555_v8, %v954_v30 }
 0x156   :  { %v632_v16 = vpop.xlane.xlu2 %631  ;;  %vm975_vm14 = vweird.f32 %v3547_v61  ;;  %v1011_v31 = vmul.f32 %v3676_v36, %v1010_v4  ;;  %v3740_v9 = vmul.f32 %v1171_v15, %v958_v3  ;;  %v968_v22 = vsel %vm3706_vm10, %v3527_v18, %v964_v17 }
 0x157   :  { %v616_v49 = vpop.xlane.xlu1 %615  ;;  %v948_v50 = vsel %vm947_vm13, %v3533_v63, %v944_v45  ;;  %v3746_v33 = vpop.eup %2183  ;;  %v983_v32 = vsub.f32 1.5, %v982_v43  ;;  %v3748_v58 = vadd.f32 1e-05, %v678_v14  ;;  %v3750_v54 = vmul.f32 %v1172_v47, %v968_v22  ;;  %v1175_v22 = vld [vmem:[%s5068_s1 + $0xd0] sm:$0xff] }
 0x158   :  { %5291 = vst [vmem:[#allocation27_spill] sm:$0xff] %v3740_v9  ;;  %v3752_v8 = vmul.f32 %v1170_v42, %v948_v50  ;;  %vm996_vm15 = vweird.f32 %v3583_v13  ;;  %vm985_vm1 = vweird.f32 %v3544_v21  ;;  %v1000_v18 = vmul.f32 %v3715_v62, %v3635_v46  ;;  %1471 = vperm.xlu0 %2120, %v3740_v9   ;;  %v624_v14 = vpop.xlane.xlu0 %623 }
 0x159   :  { %5292 = vst [vmem:[#allocation31_spill] sm:$0xff] %v3750_v54  ;;  %v679_v63 = vmul.f32 0.0051020407, %v616_v49  ;;  %v973_v4 = vsub.f32 1.5, %v972_v53  ;;  %vm976_vm2 = vweird.f32 %v3620_v10  ;;  %1476 = vperm.xlu2 %2122, %v3750_v54   ;;  %v683_v43 = vmul.f32 0.0051020407, %v632_v16  ;;  %vm3776_vm4 = vmor %vm995_vm11, %vm996_vm15 }
 0x15a   :  { %5293 = vst [vmem:[#allocation28_spill] sm:$0xff] %v3752_v8  ;;  %v3754_v30 = vpop.eup %2185  ;;  %1466 = vperm.xlu1 %2121, %v3752_v8   ;;  %vm986_vm3 = vweird.f32 %v3614_v44  ;;  %v1012_v17 = vmul.f32 0.5, %v1011_v31  ;;  %2189 = vrsqrt.f32 %v3735_v51  ;;  %v1021_v45 = vmul.f32 %v3684_v41, %v1020_v7  ;;  %v1174_v7 = vld [vmem:[%s5068_s1 + $0xc8] sm:$0xff]  ;;  %vm3831_vm11 = vmor %vm975_vm14, %vm976_vm2 }
 0x15b   :  { %v1040_v56 = vmul.f32 %v3754_v30, %v3682_v60  ;;  %v3766_v15 = vpop.eup %2187  ;;  %v3770_v49 = vadd.f32 1e-05, %v679_v63  ;;  %vm1025_vm5 = vweird.f32 %v3606_v24  ;;  %2191 = vrsqrt.f32 %v3748_v58  ;;  %vm987_vm7 = vmor %vm985_vm1, %vm986_vm3 }
 0x15c   :  { %v984_v42 = vmul.f32 %v3614_v44, %v983_v32  ;;  %v994_v53 = vmul.f32 %v3583_v13, %v993_v23  ;;  %v1001_v16 = vmul.f32 %v3715_v62, %v1000_v18  ;;  %v1050_v5 = vmul.f32 %v3746_v33, %v3662_v37 }
 0x15d   :  { %2193 = vrsqrt.f32 %v3770_v49  ;;  %v681_v31 = vmul.f32 0.0051020407, %v624_v14  ;;  %vm1026_vm6 = vweird.f32 %v3684_v41  ;;  %v1030_v32 = vmul.f32 %v3766_v15, %v3690_v1 }
 0x15e   :  { %v1041_v23 = vmul.f32 %v3754_v30, %v1040_v56  ;;  %v3803_v50 = vadd.f32 1e-05, %v683_v43  ;;  %v1013_v18 = vsub.f32 1.5, %v1012_v17  ;;  %vm1015_vm8 = vweird.f32 %v3608_v19  ;;  %v644_v43 = vpop.xlane.xlu2 %643  ;;  %vm3881_vm3 = vmor %vm1025_vm5, %vm1026_vm6 }
 0x15f   :  { %v628_v3 = vpop.xlane.xlu1 %627  ;;  %v988_v63 = vsel %vm987_vm7, %v3614_v44, %v984_v42  ;;  %v998_v14 = vsel %vm3776_vm4, %v3583_v13, %v994_v53  ;;  %v1022_v8 = vmul.f32 0.5, %v1021_v45  ;;  %vm1005_vm9 = vweird.f32 %v3635_v46  ;;  %v1173_v13 = vld [vmem:[%s5068_s1 + $0xc0] sm:$0xff] }
 0x160   :  { %vm1006_vm10 = vweird.f32 %v3715_v62  ;;  %v3812_v21 = vmul.f32 %v1174_v7, %v988_v63  ;;  %v3814_v54 = vmul.f32 %v1175_v22, %v998_v14  ;;  %v974_v56 = vmul.f32 %v3620_v10, %v973_v4  ;;  %v3817_v17 = vpop.eup %2189  ;;  %v636_v14 = vpop.xlane.xlu0 %635 }
 0x161   :  { %v1002_v9 = vmul.f32 0.5, %v1001_v16  ;;  %v1051_v44 = vmul.f32 %v3746_v33, %v1050_v5  ;;  %v3820_v42 = vadd.f32 1e-05, %v681_v31  ;;  %v682_v47 = vmul.f32 0.0051020407, %v628_v3  ;;  %v3825_v45 = vpop.eup %2191  ;;  %vm3919_vm6 = vmor %vm1005_vm9, %vm1006_vm10 }
 0x162   :  { %5296 = vst [vmem:[#allocation29_spill] sm:$0xff] %v3812_v21  ;;  %vm1016_vm12 = vweird.f32 %v3676_v36  ;;  %v1031_v53 = vmul.f32 %v3766_v15, %v1030_v32  ;;  %v1042_v16 = vmul.f32 0.5, %v1041_v23  ;;  %2195 = vrsqrt.f32 %v3803_v50  ;;  %1486 = vperm.xlu0 %2120, %v3812_v21   ;;  %1491 = vperm.xlu2 %2122, %v3814_v54  }
 0x163   :  { %5297 = vst [vmem:[#allocation32_spill] sm:$0xff] %v3814_v54  ;;  %v3840_v3 = vpop.eup %2193  ;;  %vm1055_vm13 = vweird.f32 %v3662_v37  ;;  %v978_v61 = vsel %vm3831_vm11, %v3620_v10, %v974_v56  ;;  %v686_v5 = vmul.f32 0.0051020407, %v644_v43  ;;  %v3846_v31 = vadd.f32 1e-05, %v682_v47  ;;  %v1177_v10 = vld [vmem:[%s5068_s1 + $0xe0] sm:$0xff]  ;;  %vm3866_vm15 = vmor %vm1015_vm8, %vm1016_vm12 }
 0x164   :  { %v1014_v7 = vmul.f32 %v3676_v36, %v1013_v18  ;;  %v1023_v22 = vsub.f32 1.5, %v1022_v8  ;;  %v1080_v32 = vmul.f32 %v3817_v17, %v3735_v51  ;;  %v1070_v23 = vmul.f32 %v3840_v3, %v3770_v49 }
 0x165   :  { %v3853_v63 = vmul.f32 %v1173_v13, %v978_v61  ;;  %v1003_v54 = vsub.f32 1.5, %v1002_v9  ;;  %v3855_v21 = vmul.f32 0.5, %v1051_v44  ;;  %vm1056_vm14 = vweird.f32 %v3746_v33 }
 0x166   :  { %2197 = vrsqrt.f32 %v3820_v42  ;;  %vm1035_vm1 = vweird.f32 %v3690_v1  ;;  %vm1036_vm2 = vweird.f32 %v3766_v15  ;;  %v1043_v9 = vsub.f32 1.5, %v1042_v16  ;;  %vm3955_vm8 = vmor %vm1055_vm13, %vm1056_vm14 }
 0x167   :  { %v1060_v18 = vmul.f32 %v3825_v45, %v3748_v58  ;;  %v1071_v56 = vmul.f32 %v3840_v3, %v1070_v23  ;;  %1481 = vperm.xlu1 %2121, %v3853_v63   ;;  %2199 = vrsqrt.f32 %v3846_v31  ;;  %v640_v43 = vpop.xlane.xlu1 %639  ;;  %v1032_v44 = vmul.f32 0.5, %v1031_v53  ;;  %v1178_v53 = vld [vmem:[%s5068_s1 + $0xe8] sm:$0xff]  ;;  %vm3980_vm10 = vmor %vm1035_vm1, %vm1036_vm2 }
 0x168   :  { %v3885_v13 = vadd.f32 1e-05, %v686_v5  ;;  %v684_v47 = vmul.f32 0.0051020407, %v636_v14  ;;  %v1018_v4 = vsel %vm3866_vm15, %v3676_v36, %v1014_v7  ;;  %v3890_v16 = vpop.eup %2195  ;;  %v1081_v61 = vmul.f32 %v3817_v17, %v1080_v32  ;;  %v1176_v32 = vld [vmem:[%s5068_s1 + $0xd8] sm:$0xff] }
 0x169   :  { %vm1045_vm4 = vweird.f32 %v3682_v60  ;;  %v3894_v23 = vmul.f32 %v1177_v10, %v1018_v4  ;;  %v1024_v24 = vmul.f32 %v3684_v41, %v1023_v22  ;;  %v1072_v5 = vmul.f32 0.5, %v1071_v56  ;;  %v3927_v19 = vpop.permute.xlu2 %1371 }
 0x16a   :  { %v3900_v14 = vadd.f32 1e-05, %v684_v47  ;;  %v1004_v8 = vmul.f32 %v3715_v62, %v1003_v54  ;;  %v685_v36 = vmul.f32 0.0051020407, %v640_v43  ;;  %vm1046_vm5 = vweird.f32 %v3754_v30  ;;  %v1181_v54 = vld [vmem:[%s5068_s1 + $0x100] sm:$0xff] }
 0x16b   :  { %v1061_v7 = vmul.f32 %v3825_v45, %v1060_v18  ;;  %1501 = vperm.xlu0 %2120, %v3894_v23   ;;  %v1028_v22 = vsel %vm3881_vm3, %v3684_v41, %v1024_v24  ;;  %v1044_v10 = vmul.f32 %v3754_v30, %v1043_v9  ;;  %v1053_v18 = vsub.f32 1.5, %v3855_v21  ;;  %v1180_v21 = vld [vmem:[%s5068_s1 + $0xf8] sm:$0xff]  ;;  %vm1047_vm7 = vmor %vm1045_vm4, %vm1046_vm5 }
 0x16c   :  { %v3913_v56 = vpop.eup %2197  ;;  %v1033_v43 = vsub.f32 1.5, %v1032_v44  ;;  %2201 = vrsqrt.f32 %v3885_v13  ;;  %v3925_v41 = vmul.f32 %v1178_v53, %v1028_v22  ;;  %v1082_v47 = vmul.f32 0.5, %v1081_v61 }
 0x16d   :  { %v3929_v9 = vpop.eup %2199  ;;  %v1110_v4 = vmul.f32 %v3890_v16, %v3803_v50  ;;  %v1008_v46 = vsel %vm3919_vm6, %v3715_v62, %v1004_v8  ;;  %v3936_v24 = vadd.f32 1e-05, %v685_v36  ;;  %v1073_v44 = vsub.f32 1.5, %v1072_v5 }
 0x16e   :  { %v1100_v61 = vmul.f32 %v3929_v9, %v3846_v31  ;;  %2203 = vrsqrt.f32 %v3900_v14  ;;  %1506 = vperm.xlu2 %2122, %v3925_v41   ;;  %v3949_v62 = vmul.f32 %v1176_v32, %v1008_v46  ;;  %v1062_v60 = vmul.f32 0.5, %v1061_v7 }
 0x16f   :  { %v1090_v5 = vmul.f32 %v3913_v56, %v3820_v42  ;;  %2205 = vrsqrt.f32 %v3936_v24  ;;  %v1048_v8 = vsel %vm1047_vm7, %v3754_v30, %v1044_v10  ;;  %vm1076_vm9 = vweird.f32 %v3840_v3 }
 0x170   :  { %v1101_v36 = vmul.f32 %v3929_v9, %v1100_v61  ;;  %1496 = vperm.xlu1 %2121, %v3949_v62   ;;  %v3966_v22 = vmul.f32 %v1180_v21, %v1048_v8  ;;  %v1054_v37 = vmul.f32 %v3746_v33, %v1053_v18  ;;  %v1083_v32 = vsub.f32 1.5, %v1082_v47 }
 0x171   :  { %v1111_v7 = vmul.f32 %v3890_v16, %v1110_v4  ;;  %v1034_v46 = vmul.f32 %v3766_v15, %v1033_v43  ;;  %vm1075_vm11 = vweird.f32 %v3770_v49  ;;  %v1074_v4 = vmul.f32 %v3840_v3, %v1073_v44 }
 0x172   :  { %v3974_v30 = vpop.eup %2201  ;;  %v1102_v18 = vmul.f32 0.5, %v1101_v36  ;;  %v1058_v47 = vsel %vm3955_vm8, %v3746_v33, %v1054_v37  ;;  %vm1085_vm12 = vweird.f32 %v3735_v51  ;;  %vm1086_vm13 = vweird.f32 %v3817_v17  ;;  %vm3993_vm14 = vmor %vm1075_vm11, %vm1076_vm9  ;;  %v1179_v33 = vld [vmem:[%s5068_s1 + $0xf0] sm:$0xff] }
 0x173   :  { %v1063_v43 = vsub.f32 1.5, %v1062_v60  ;;  %v1091_v49 = vmul.f32 %v3913_v56, %v1090_v5  ;;  %1516 = vperm.xlu0 %2120, %v3966_v22   ;;  %v4004_v44 = vmul.f32 %v1181_v54, %v1058_v47  ;;  %v1038_v61 = vsel %vm3980_vm10, %v3766_v15, %v1034_v46  ;;  %v1183_v60 = vld [vmem:[%s5068_s1 + $0x110] sm:$0xff]  ;;  %vm4024_vm15 = vmor %vm1085_vm12, %vm1086_vm13  ;;  %v1186_v15 = vld [vmem:[%s5068_s1 + $0x128] sm:$0xff] }
 0x174   :  { %v4002_v21 = vpop.eup %2203  ;;  %v1078_v53 = vsel %vm3993_vm14, %v3840_v3, %v1074_v4  ;;  %v1112_v8 = vmul.f32 0.5, %v1111_v7  ;;  %v1140_v36 = vmul.f32 %v3974_v30, %v3885_v13  ;;  %v1103_v37 = vsub.f32 1.5, %v1102_v18 }
 0x175   :  { %v4015_v5 = vpop.eup %2205  ;;  %v1084_v54 = vmul.f32 %v3817_v17, %v1083_v32  ;;  %vm1065_vm1 = vweird.f32 %v3748_v58  ;;  %vm1066_vm2 = vweird.f32 %v3825_v45  ;;  %v4033_v7 = vmul.f32 %v1179_v33, %v1038_v61  ;;  %v1184_v33 = vld [vmem:[%s5068_s1 + $0x118] sm:$0xff] }
 0x176   :  { %v1130_v3 = vmul.f32 %v4015_v5, %v3936_v24  ;;  %1521 = vperm.xlu2 %2122, %v4004_v44   ;;  %v1092_v46 = vmul.f32 0.5, %v1091_v49  ;;  %v1120_v51 = vmul.f32 %v4002_v21, %v3900_v14  ;;  %v4039_v10 = vmul.f32 %v1183_v60, %v1078_v53  ;;  %vm4057_vm4 = vmor %vm1065_vm1, %vm1066_vm2 }
 0x177   :  { %v4035_v32 = vpop.permute.xlu2 %1376  ;;  %v1064_v18 = vmul.f32 %v3825_v45, %v1063_v43  ;;  %vm1106_vm3 = vweird.f32 %v3929_v9  ;;  %v1113_v4 = vsub.f32 1.5, %v1112_v8  ;;  %v1141_v1 = vmul.f32 %v3974_v30, %v1140_v36 }
 0x178   :  { %v1131_v47 = vmul.f32 %v4015_v5, %v1130_v3  ;;  %1511 = vperm.xlu1 %2121, %v4033_v7   ;;  %v1088_v49 = vsel %vm4024_vm15, %v3817_v17, %v1084_v54  ;;  %v1104_v61 = vmul.f32 %v3929_v9, %v1103_v37  ;;  %vm1115_vm5 = vweird.f32 %v3803_v50 }
 0x179   :  { %vm1105_vm6 = vweird.f32 %v3846_v31  ;;  %vm1116_vm7 = vweird.f32 %v3890_v16  ;;  %v1093_v17 = vsub.f32 1.5, %v1092_v46  ;;  %v1121_v8 = vmul.f32 %v4002_v21, %v1120_v51  ;;  %v1182_v31 = vld [vmem:[%s5068_s1 + $0x108] sm:$0xff] }
 0x17a   :  { %v1132_v53 = vmul.f32 0.5, %v1131_v47  ;;  %vm4064_vm8 = vmor %vm1105_vm6, %vm1106_vm3  ;;  %v1068_v58 = vsel %vm4057_vm4, %v3825_v45, %v1064_v18  ;;  %v4076_v37 = vmul.f32 %v1184_v33, %v1088_v49  ;;  %v1142_v3 = vmul.f32 0.5, %v1141_v1  ;;  %v1187_v49 = vld [vmem:[%s5068_s1 + $0x130] sm:$0xff] }
 0x17b   :  { %1531 = vperm.xlu0 %2120, %v4039_v10   ;;  %v1108_v54 = vsel %vm4064_vm8, %v3929_v9, %v1104_v61  ;;  %v1114_v46 = vmul.f32 %v3890_v16, %v1113_v4  ;;  %vm4087_vm9 = vmor %vm1115_vm5, %vm1116_vm7  ;;  %vm1095_vm10 = vweird.f32 %v3820_v42  ;;  %v4093_v51 = vmul.f32 %v1182_v31, %v1068_v58  ;;  %v1190_v58 = vld [vmem:[%s5068_s1 + $0x148] sm:$0xff]  ;;  %v1188_v31 = vld [vmem:[%s5068_s1 + $0x138] sm:$0xff] }
 0x17c   :  { %v1133_v36 = vsub.f32 1.5, %v1132_v53  ;;  %vm1096_vm11 = vweird.f32 %v3913_v56  ;;  %v1122_v18 = vmul.f32 0.5, %v1121_v8  ;;  %v4098_v47 = vmul.f32 %v1186_v15, %v1108_v54 }
 0x17d   :  { %v1094_v4 = vmul.f32 %v3913_v56, %v1093_v17  ;;  %vm1136_vm12 = vweird.f32 %v4015_v5  ;;  %v1143_v42 = vsub.f32 1.5, %v1142_v3  ;;  %v1118_v1 = vsel %vm4087_vm9, %v3890_v16, %v1114_v46  ;;  %vm1097_vm13 = vmor %vm1095_vm10, %vm1096_vm11  ;;  %v1185_v16 = vld [vmem:[%s5068_s1 + $0x120] sm:$0xff]  ;;  %v1234_v3 = vld [vmem:[%s5069_s2 + $0x8] sm:$0xff] }
 0x17e   :  { %1536 = vperm.xlu2 %2122, %v4076_v37   ;;  %v1134_v50 = vmul.f32 %v4015_v5, %v1133_v36  ;;  %vm1135_vm14 = vweird.f32 %v3936_v24  ;;  %vm1145_vm15 = vweird.f32 %v3885_v13  ;;  %vm1146_vm1 = vweird.f32 %v3974_v30  ;;  %v1189_v13 = vld [vmem:[%s5068_s1 + $0x140] sm:$0xff] }
 0x17f   :  { %v4095_v9 = vpop.permute.xlu2 %1386  ;;  %v1123_v33 = vsub.f32 1.5, %v1122_v18  ;;  %vm1137_vm2 = vmor %vm1135_vm14, %vm1136_vm12  ;;  %v1098_v61 = vsel %vm1097_vm13, %v3913_v56, %v1094_v4  ;;  %v4118_v43 = vmul.f32 %v1187_v49, %v1118_v1  ;;  %v1144_v24 = vmul.f32 %v3974_v30, %v1143_v42  ;;  %v1233_v4 = vld [vmem:[%s5069_s2] sm:$0xff] }
 0x180   :  { %1526 = vperm.xlu1 %2121, %v4093_v51   ;;  %v1138_v53 = vsel %vm1137_vm2, %v4015_v5, %v1134_v50  ;;  %vm1147_vm3 = vmor %vm1145_vm15, %vm1146_vm1  ;;  %v4126_v17 = vmul.f32 %v1185_v16, %v1098_v61  ;;  %vm1125_vm4 = vweird.f32 %v3900_v14  ;;  %vm1126_vm5 = vweird.f32 %v4002_v21  ;;  %v1237_v49 = vld [vmem:[%s5069_s2 + $0x20] sm:$0xff]  ;;  %v1238_v61 = vld [vmem:[%s5069_s2 + $0x28] sm:$0xff] }
 0x181   :  { %v4130_v56 = vmul.f32 %v1189_v13, %v1138_v53  ;;  %v1124_v60 = vmul.f32 %v4002_v21, %v1123_v33  ;;  %v1148_v8 = vsel %vm1147_vm3, %v3974_v30, %v1144_v24  ;;  %vm1127_vm6 = vmor %vm1125_vm4, %vm1126_vm5  ;;  %v1276_v30 = vmul.f32 %v3226_v20, %v2878_v6  ;;  %v1235_v6 = vld [vmem:[%s5069_s2 + $0x10] sm:$0xff]  ;;  %v1240_v24 = vld [vmem:[%s5069_s2 + $0x38] sm:$0xff] }
 0x182   :  { %v4145_v36 = vmul.f32 %v1190_v58, %v1148_v8  ;;  %v1275_v20 = vmul.f32 %v3194_v55, %v2860_v11  ;;  %v1280_v11 = vmul.f32 %v3314_v27, %v2874_v2  ;;  %v1282_v2 = vmul.f32 %v3323_v28, %v2903_v40  ;;  %v1241_v8 = vld [vmem:[%s5069_s2 + $0x40] sm:$0xff]  ;;  %v1239_v28 = vld [vmem:[%s5069_s2 + $0x30] sm:$0xff] }
 0x183   :  { %1546 = vperm.xlu0 %2120, %v4098_v47   ;;  %v1128_v14 = vsel %vm1127_vm6, %v4002_v21, %v1124_v60  ;;  %v5320_v21 = vld [vmem:[#allocation39_spill] sm:$0xff]  ;;  %v1318_v18 = vsub.f32 %v1234_v3, %v1276_v30  ;;  %v4170_v50 = vpop.permute.xlu0 %1361  ;;  %v1281_v40 = vmul.f32 %v3376_v0, %v2901_v35  ;;  %v5321_v35 = vld [vmem:[#allocation16_spill] sm:$0xff] }
 0x184   :  { %v4152_v15 = vmul.f32 %v1188_v31, %v1128_v14  ;;  %v1277_v46 = vmul.f32 %v3189_v34, %v5320_v21  ;;  %v1279_v34 = vmul.f32 %v3275_v39, %v2872_v52  ;;  %v1317_v1 = vsub.f32 %v1233_v4, %v1275_v20  ;;  %v1236_v39 = vld [vmem:[%s5069_s2 + $0x18] sm:$0xff]  ;;  %v1243_v31 = vld [vmem:[%s5069_s2 + $0x50] sm:$0xff] }
 0x185   :  { %v1278_v52 = vmul.f32 %v3265_v12, %v2876_v57  ;;  %v1322_v53 = vsub.f32 %v1238_v61, %v1280_v11  ;;  %v1283_v57 = vmul.f32 %v3374_v48, %v2899_v59  ;;  %v1324_v60 = vsub.f32 %v1240_v24, %v1282_v2  ;;  %v1244_v21 = vld [vmem:[%s5069_s2 + $0x58] sm:$0xff]  ;;  %v5327_v61 = vld [vmem:[#allocation24_spill] sm:$0xff]  ;;  %v5328_v2 = vld [vmem:[#allocation42_spill] sm:$0xff] }
 0x186   :  { %1551 = vperm.xlu2 %2122, %v4118_v43   ;;  %v1319_v42 = vsub.f32 %v1235_v6, %v1277_v46  ;;  %v1321_v55 = vsub.f32 %v1237_v49, %v1279_v34  ;;  %v1285_v59 = vmul.f32 %v3430_v29, %v2924_v26  ;;  %v1323_v48 = vsub.f32 %v1239_v28, %v1281_v40  ;;  %v5322_v46 = vld [vmem:[#allocation40_spill] sm:$0xff]  ;;  %v1242_v6 = vld [vmem:[%s5069_s2 + $0x48] sm:$0xff]  ;;  %v5330_v28 = vld [vmem:[#allocation46_spill] sm:$0xff] }
 0x187   :  { %v4134_v5 = vpop.permute.xlu2 %1401  ;;  %v1320_v27 = vsub.f32 %v1236_v39, %v1278_v52  ;;  %v1325_v14 = vsub.f32 %v1241_v8, %v1283_v57  ;;  %v1286_v0 = vmul.f32 %v5321_v35, %v2920_v25  ;;  %v5325_v25 = vld [vmem:[#allocation20_spill] sm:$0xff]  ;;  %v1246_v49 = vld [vmem:[%s5069_s2 + $0x68] sm:$0xff] }
 0x188   :  { %1541 = vperm.xlu1 %2121, %v4126_v17   ;;  %v1327_v3 = vsub.f32 %v1243_v31, %v1285_v59  ;;  %v1249_v31 = vld [vmem:[%s5069_s2 + $0x80] sm:$0xff]  ;;  %v5332_v35 = vld [vmem:[#allocation44_spill] sm:$0xff] }
 0x189   :  { %v1328_v20 = vsub.f32 %v1244_v21, %v1286_v0  ;;  %v1292_v0 = vmul.f32 %v3600_v38, %v5332_v35  ;;  %v1250_v21 = vld [vmem:[%s5069_s2 + $0x88] sm:$0xff] }
 0x18a   :  { %v4147_v54 = vpop.permute.xlu1 %1366  ;;  %v5336_v38 = vld [vmem:[#allocation23_spill] sm:$0xff] }
 0x18b   :  { %1561 = vperm.xlu0 %2120, %v4130_v56   ;;  %v5342_v35 = vld [vmem:[#allocation27_spill] sm:$0xff] }
 0x18e   :  { %1566 = vperm.xlu2 %2122, %v4145_v36  }
 0x18f   :  { %v4160_v45 = vpop.permute.xlu2 %1416 }
 0x190   :  { %1556 = vperm.xlu1 %2121, %v4152_v15  }
 0x192   :  { %v4177_v33 = vpop.permute.xlu1 %1381 }
 0x193   :  { %1660 = vperm.xlu0 %2120, %v1318_v18   ;;  %v5323_v18 = vld [vmem:[#allocation17_spill] sm:$0xff] }
 0x194   :  { %v1284_v26 = vmul.f32 %v5323_v18, %v5322_v46  ;;  %v5333_v18 = vld [vmem:[#allocation45_spill] sm:$0xff] }
 0x196   :  { %1665 = vperm.xlu2 %2122, %v1319_v42   ;;  %v5324_v42 = vld [vmem:[#allocation43_spill] sm:$0xff] }
 0x197   :  { %v4184_v16 = vpop.permute.xlu2 %1431  ;;  %v1288_v34 = vmul.f32 %v5325_v25, %v5324_v42  ;;  %v1334_v25 = vsub.f32 %v1250_v21, %v1292_v0  ;;  %v1255_v21 = vld [vmem:[%s5069_s2 + $0xb0] sm:$0xff] }
 0x198   :  { %1655 = vperm.xlu1 %2121, %v1317_v1   ;;  %v1326_v1 = vsub.f32 %v1242_v6, %v1284_v26  ;;  %v5334_v26 = vld [vmem:[#allocation22_spill] sm:$0xff] }
 0x199   :  { %v1330_v39 = vsub.f32 %v1246_v49, %v1288_v34  ;;  %v1290_v6 = vmul.f32 %v5334_v26, %v5333_v18  ;;  %v5335_v34 = vld [vmem:[#allocation49_spill] sm:$0xff]  ;;  %v5343_v18 = vld [vmem:[#allocation50_spill] sm:$0xff]  ;;  %v5344_v26 = vld [vmem:[#allocation31_spill] sm:$0xff] }
 0x19a   :  { %v4191_v13 = vpop.permute.xlu0 %1396 }
 0x19b   :  { %1675 = vperm.xlu0 %2120, %v1321_v55   ;;  %v5326_v55 = vld [vmem:[#allocation41_spill] sm:$0xff] }
 0x19c   :  { %v1289_v52 = vmul.f32 %v5327_v61, %v5326_v55  ;;  %v1252_v61 = vld [vmem:[%s5069_s2 + $0x98] sm:$0xff] }
 0x19e   :  { %1680 = vperm.xlu2 %2122, %v1322_v53   ;;  %v1247_v53 = vld [vmem:[%s5069_s2 + $0x70] sm:$0xff] }
 0x19f   :  { %v4200_v12 = vpop.permute.xlu1 %1391  ;;  %v1331_v8 = vsub.f32 %v1247_v53, %v1289_v52  ;;  %v5337_v52 = vld [vmem:[#allocation47_spill] sm:$0xff] }
 0x1a0   :  { %1670 = vperm.xlu1 %2121, %v1320_v27   ;;  %v5329_v27 = vld [vmem:[#allocation21_spill] sm:$0xff] }
 0x1a1   :  { %v4210_v58 = vpop.permute.xlu2 %1446  ;;  %v1287_v24 = vmul.f32 %v5329_v27, %v5328_v2  ;;  %v1253_v27 = vld [vmem:[%s5069_s2 + $0xa0] sm:$0xff] }
 0x1a3   :  { %1690 = vperm.xlu0 %2120, %v1324_v60   ;;  %v1245_v60 = vld [vmem:[%s5069_s2 + $0x60] sm:$0xff] }
 0x1a6   :  { %1695 = vperm.xlu2 %2122, %v1325_v14   ;;  %v5331_v14 = vld [vmem:[#allocation25_spill] sm:$0xff] }
 0x1a7   :  { %v4217_v30 = vpop.permute.xlu0 %1411  ;;  %v1291_v59 = vmul.f32 %v5331_v14, %v5330_v28  ;;  %v1251_v28 = vld [vmem:[%s5069_s2 + $0x90] sm:$0xff] }
 0x1a8   :  { %1685 = vperm.xlu1 %2121, %v1323_v48   ;;  %v1329_v48 = vsub.f32 %v1245_v60, %v1287_v24  ;;  %v5339_v24 = vld [vmem:[#allocation48_spill] sm:$0xff]  ;;  %v5340_v60 = vld [vmem:[#allocation30_spill] sm:$0xff] }
 0x1a9   :  { %v4226_v29 = vpop.permute.xlu1 %1406 }
 0x1aa   :  { %v4231_v4 = vpop.permute.xlu2 %1461 }
 0x1ab   :  { %1705 = vperm.xlu0 %2120, %v1327_v3   ;;  %v1333_v3 = vsub.f32 %v1249_v31, %v1291_v59  ;;  %v5341_v31 = vld [vmem:[#allocation52_spill] sm:$0xff] }
 0x1ac   :  { %v1297_v0 = vmul.f32 %v5342_v35, %v5341_v31 }
 0x1ae   :  { %1710 = vperm.xlu2 %2122, %v1328_v20   ;;  %v1248_v20 = vld [vmem:[%s5069_s2 + $0x78] sm:$0xff] }
 0x1af   :  { %v4238_v11 = vpop.permute.xlu0 %1426  ;;  %v1332_v49 = vsub.f32 %v1248_v20, %v1290_v6  ;;  %v1298_v6 = vmul.f32 %v5344_v26, %v5343_v18  ;;  %v1257_v26 = vld [vmem:[%s5069_s2 + $0xc0] sm:$0xff] }
 0x1b0   :  { %1700 = vperm.xlu1 %2121, %v1326_v1   ;;  %v1294_v1 = vmul.f32 %v5336_v38, %v5335_v34  ;;  %v1256_v34 = vld [vmem:[%s5069_s2 + $0xb8] sm:$0xff]  ;;  %v5345_v38 = vld [vmem:[#allocation51_spill] sm:$0xff] }
 0x1b1   :  { %v4247_v57 = vpop.permute.xlu1 %1421 }
 0x1b2   :  { %v1336_v2 = vsub.f32 %v1252_v61, %v1294_v1  ;;  %v5346_v1 = vld [vmem:[#allocation28_spill] sm:$0xff]  ;;  %v1254_v61 = vld [vmem:[%s5069_s2 + $0xa8] sm:$0xff] }
 0x1b3   :  { %1720 = vperm.xlu0 %2120, %v1330_v39   ;;  %v4252_v40 = vpop.permute.xlu2 %1476  ;;  %v5338_v39 = vld [vmem:[#allocation26_spill] sm:$0xff] }
 0x1b4   :  { %v1295_v53 = vmul.f32 %v5338_v39, %v5337_v52  ;;  %v1340_v52 = vsub.f32 %v1256_v34, %v1298_v6 }
 0x1b6   :  { %1725 = vperm.xlu2 %2122, %v1331_v8   ;;  %v1293_v8 = vmul.f32 %v5340_v60, %v5339_v24  ;;  %v1337_v59 = vsub.f32 %v1253_v27, %v1295_v53  ;;  %v5347_v53 = vld [vmem:[#allocation54_spill] sm:$0xff]  ;;  %v1258_v60 = vld [vmem:[%s5069_s2 + $0xc8] sm:$0xff] }
 0x1b7   :  { %v4264_v46 = vpop.permute.xlu0 %1441 }
 0x1b8   :  { %1715 = vperm.xlu1 %2121, %v1329_v48  }
 0x1b9   :  { %v4271_v42 = vpop.permute.xlu1 %1436 }
 0x1bb   :  { %1735 = vperm.xlu0 %2120, %v1333_v3   ;;  %v1335_v3 = vsub.f32 %v1251_v28, %v1293_v8  ;;  %v5349_v28 = vld [vmem:[#allocation2_spill] sm:$0xff] }
 0x1bc   :  { %v4275_v55 = vpop.permute.xlu2 %1491 }
 0x1be   :  { %1740 = vperm.xlu2 %2122, %v1334_v25   ;;  %v1339_v25 = vsub.f32 %v1255_v21, %v1297_v0  ;;  %v5351_v21 = vld [vmem:[#allocation53_spill] sm:$0xff] }
 0x1bf   :  { %v1299_v18 = vmul.f32 %v3853_v63, %v5351_v21  ;;  %v5356_v21 = vld [vmem:[#allocation4_spill] sm:$0xff] }
 0x1c0   :  { %1730 = vperm.xlu1 %2121, %v1332_v49   ;;  %v1296_v49 = vmul.f32 %v5346_v1, %v5345_v38 }
 0x1c1   :  { %v4290_v14 = vpop.permute.xlu0 %1456  ;;  %v1341_v1 = vsub.f32 %v1257_v26, %v1299_v18 }
 0x1c2   :  { %v1338_v24 = vsub.f32 %v1254_v61, %v1296_v49  ;;  %v1261_v49 = vld [vmem:[%s5069_s2 + $0xe0] sm:$0xff] }
 0x1c3   :  { %1750 = vperm.xlu0 %2120, %v1336_v2   ;;  %v4292_v48 = vpop.permute.xlu1 %1451  ;;  %v5348_v2 = vld [vmem:[#allocation29_spill] sm:$0xff]  ;;  %v5353_v61 = vld [vmem:[#allocation6_spill] sm:$0xff] }
 0x1c4   :  { %v1300_v27 = vmul.f32 %v5348_v2, %v5347_v53  ;;  %v1304_v63 = vmul.f32 %v3925_v41, %v5353_v61  ;;  %v5355_v41 = vld [vmem:[#allocation8_spill] sm:$0xff] }
 0x1c6   :  { %1755 = vperm.xlu2 %2122, %v1337_v59   ;;  %v5350_v59 = vld [vmem:[#allocation32_spill] sm:$0xff]  ;;  %v1342_v0 = vsub.f32 %v1258_v60, %v1300_v27  ;;  %v5354_v27 = vld [vmem:[#allocation3_spill] sm:$0xff]  ;;  %v1260_v60 = vld [vmem:[%s5069_s2 + $0xd8] sm:$0xff] }
 0x1c7   :  { %v1301_v31 = vmul.f32 %v5350_v59, %v5349_v28  ;;  %v1306_v59 = vmul.f32 %v3966_v22, %v5355_v41  ;;  %v5357_v22 = vld [vmem:[#allocation5_spill] sm:$0xff] }
 0x1c8   :  { %1745 = vperm.xlu1 %2121, %v1335_v3   ;;  %v4301_v20 = vpop.permute.xlu2 %1506  ;;  %v1259_v3 = vld [vmem:[%s5069_s2 + $0xd0] sm:$0xff] }
 0x1c9   :  { %v1343_v6 = vsub.f32 %v1259_v3, %v1301_v31  ;;  %v1264_v3 = vld [vmem:[%s5069_s2 + $0xf8] sm:$0xff] }
 0x1ca   :  { %v4311_v39 = vpop.permute.xlu0 %1471  ;;  %v1348_v26 = vsub.f32 %v1264_v3, %v1306_v59 }
 0x1cb   :  { %1765 = vperm.xlu0 %2120, %v1339_v25   ;;  %v5352_v25 = vld [vmem:[#allocation7_spill] sm:$0xff] }
 0x1cc   :  { %v4318_v8 = vpop.permute.xlu1 %1466  ;;  %v1303_v34 = vmul.f32 %v3894_v23, %v5352_v25  ;;  %v1262_v23 = vld [vmem:[%s5069_s2 + $0xe8] sm:$0xff]  ;;  %v1305_v25 = vmul.f32 %v4033_v7, %v5357_v22  ;;  %v5359_v7 = vld [vmem:[#allocation12_spill] sm:$0xff] }
 0x1cd   :  { %v1346_v28 = vsub.f32 %v1262_v23, %v1304_v63  ;;  %v1267_v23 = vld [vmem:[%s5069_s2 + $0x110] sm:$0xff] }
 0x1ce   :  { %1770 = vperm.xlu2 %2122, %v1340_v52   ;;  %v1345_v2 = vsub.f32 %v1261_v49, %v1303_v34 }
 0x1d0   :  { %1760 = vperm.xlu1 %2121, %v1338_v24   ;;  %v4322_v35 = vpop.permute.xlu2 %1521  ;;  %v1302_v24 = vmul.f32 %v3949_v62, %v5354_v27  ;;  %v1307_v62 = vmul.f32 %v4004_v44, %v5356_v21  ;;  %v5358_v44 = vld [vmem:[#allocation13_spill] sm:$0xff]  ;;  %v1310_v27 = vmul.f32 %v4076_v37, %v5359_v7  ;;  %v5361_v37 = vld [vmem:[#allocation14_spill] sm:$0xff]  ;;  %v1271_v7 = vld [vmem:[%s5069_s2 + $0x130] sm:$0xff] }
 0x1d1   :  { %v1309_v61 = vmul.f32 %v4039_v10, %v5358_v44  ;;  %v5360_v10 = vld [vmem:[#allocation9_spill] sm:$0xff]  ;;  %v1312_v21 = vmul.f32 %v4098_v47, %v5361_v37 }
 0x1d2   :  { %v1308_v41 = vmul.f32 %v4093_v51, %v5360_v10  ;;  %v2207_v51 = vld [vmem:[%s5067_s0 + $0x20] sm:$0xff] }
 0x1d3   :  { %1780 = vperm.xlu0 %2120, %v1342_v0   ;;  %v1344_v0 = vsub.f32 %v1260_v60, %v1302_v24  ;;  %v1351_v60 = vsub.f32 %v1267_v23, %v1309_v61  ;;  %v1573_v22 = vmul.f32 %v2207_v51, %v3927_v19 }
 0x1d4   :  { %v4334_v38 = vpop.permute.xlu0 %1486 }
 0x1d6   :  { %1785 = vperm.xlu2 %2122, %v1343_v6   ;;  %v1265_v6 = vld [vmem:[%s5069_s2 + $0x100] sm:$0xff] }
 0x1d7   :  { %v1349_v49 = vsub.f32 %v1265_v6, %v1307_v62  ;;  %v1270_v6 = vld [vmem:[%s5069_s2 + $0x128] sm:$0xff] }
 0x1d8   :  { %1775 = vperm.xlu1 %2121, %v1341_v1   ;;  %v4341_v52 = vpop.permute.xlu2 %1536  ;;  %v1263_v1 = vld [vmem:[%s5069_s2 + $0xf0] sm:$0xff]  ;;  %v1354_v23 = vsub.f32 %v1270_v6, %v1312_v21  ;;  %v1273_v21 = vld [vmem:[%s5069_s2 + $0x140] sm:$0xff]  ;;  %v2210_v6 = vld [vmem:[%s5067_s0 + $0x58] sm:$0xff] }
 0x1d9   :  { %v4343_v53 = vpop.permute.xlu1 %1481  ;;  %v1580_v51 = vmul.f32 %v2210_v6, %v4095_v9 }
 0x1db   :  { %1795 = vperm.xlu0 %2120, %v1345_v2   ;;  %v1347_v2 = vsub.f32 %v1263_v1, %v1305_v25  ;;  %v2208_v25 = vld [vmem:[%s5067_s0 + $0x28] sm:$0xff]  ;;  %v5362_v1 = vld [vmem:[#allocation10_spill] sm:$0xff] }
 0x1dc   :  { %v1574_v47 = vmul.f32 %v2208_v25, %v3927_v19  ;;  %v1269_v19 = vld [vmem:[%s5069_s2 + $0x120] sm:$0xff] }
 0x1dd   :  { %v4355_v31 = vpop.permute.xlu0 %1501 }
 0x1de   :  { %1800 = vperm.xlu2 %2122, %v1346_v28   ;;  %v1268_v28 = vld [vmem:[%s5069_s2 + $0x118] sm:$0xff] }
 0x1df   :  { %v1352_v3 = vsub.f32 %v1268_v28, %v1310_v27  ;;  %v5363_v27 = vld [vmem:[#allocation11_spill] sm:$0xff] }
 0x1e0   :  { %1790 = vperm.xlu1 %2121, %v1344_v0   ;;  %v4362_v18 = vpop.permute.xlu2 %1551  ;;  %v1266_v0 = vld [vmem:[%s5069_s2 + $0x108] sm:$0xff] }
 0x1e2   :  { %v4369_v34 = vpop.permute.xlu1 %1496 }
 0x1e3   :  { %1810 = vperm.xlu0 %2120, %v1348_v26   ;;  %v1350_v26 = vsub.f32 %v1266_v0, %v1308_v41  ;;  %v5364_v0 = vld [vmem:[#allocation19_spill] sm:$0xff] }
 0x1e5   :  { %v4376_v63 = vpop.permute.xlu0 %1516 }
 0x1e6   :  { %1815 = vperm.xlu2 %2122, %v1349_v49   ;;  %v1313_v49 = vmul.f32 %v4118_v43, %v5362_v1 }
 0x1e8   :  { %1805 = vperm.xlu1 %2121, %v1347_v2   ;;  %v4383_v24 = vpop.permute.xlu2 %1566  ;;  %v1355_v43 = vsub.f32 %v1271_v7, %v1313_v49 }
 0x1ea   :  { %v4390_v59 = vpop.permute.xlu1 %1511 }
 0x1eb   :  { %1825 = vperm.xlu0 %2120, %v1351_v60   ;;  %v1311_v60 = vmul.f32 %v4126_v17, %v5363_v27 }
 0x1ed   :  { %v4397_v62 = vpop.permute.xlu0 %1531  ;;  %v1353_v17 = vsub.f32 %v1269_v19, %v1311_v60 }
 0x1ee   :  { %1830 = vperm.xlu2 %2122, %v1352_v3   ;;  %v1315_v3 = vmul.f32 %v4130_v56, %v5364_v0  ;;  %v2209_v56 = vld [vmem:[%s5067_s0 + $0x50] sm:$0xff] }
 0x1f0   :  { %1820 = vperm.xlu1 %2121, %v1350_v26   ;;  %v1666_v44 = vpop.permute.xlu2 %1665  ;;  %v1579_v26 = vmul.f32 %v2209_v56, %v4095_v9  ;;  %v1272_v9 = vld [vmem:[%s5069_s2 + $0x138] sm:$0xff] }
 0x1f1   :  { %v1867_v61 = vadd.f32 %v1666_v44, %v1573_v22  ;;  %v1868_v2 = vadd.f32 %v1666_v44, %v1574_v47  ;;  %v5365_v22 = vld [vmem:[#allocation18_spill] sm:$0xff]  ;;  %v1357_v44 = vsub.f32 %v1273_v21, %v1315_v3 }
 0x1f2   :  { %v4417_v28 = vpop.permute.xlu1 %1526  ;;  %v1316_v25 = vmul.f32 %v4145_v36, %v5365_v22 }
 0x1f3   :  { %v1951_v10 = vmax.f32 %v1867_v61, 0.0  ;;  %v1952_v41 = vmax.f32 %v1868_v2, 0.0  ;;  %1840 = vperm.xlu0 %2120, %v1354_v23   ;;  %v1274_v61 = vld [vmem:[%s5069_s2 + $0x148] sm:$0xff] }
 0x1f4   :  { %v5366_v2 = vld [vmem:[#allocation15_spill] sm:$0xff]  ;;  %v1358_v36 = vsub.f32 %v1274_v61, %v1316_v25  ;;  %v2214_v25 = vld [vmem:[%s5067_s0 + $0x18] sm:$0xff] }
 0x1f5   :  { %2035 = vst [vmem:[%s5070_s3 + $0x20] sm:$0xff] %v1951_v10  ;;  %v4427_v37 = vpop.permute.xlu0 %1546  ;;  %v1314_v23 = vmul.f32 %v4152_v15, %v5366_v2 }
 0x1f6   :  { %2036 = vst.msk [vmem:[%s5070_s3 + $0x28] sm:$0xff] %vm98_vm0, %v1952_v41  ;;  %1845 = vperm.xlu2 %2122, %v1355_v43   ;;  %v2211_v41 = vld [vmem:[%s5067_s0 + $0x80] sm:$0xff]  ;;  %v2212_v43 = vld [vmem:[%s5067_s0 + $0x88] sm:$0xff] }
 0x1f7   :  { %v1356_v15 = vsub.f32 %v1272_v9, %v1314_v23  ;;  %v1585_v19 = vmul.f32 %v2211_v41, %v4134_v5  ;;  %v1586_v0 = vmul.f32 %v2212_v43, %v4134_v5  ;;  %v1572_v5 = vmul.f32 %v2214_v25, %v4147_v54  ;;  %v2217_v9 = vld [vmem:[%s5067_s0] sm:$0xff] }
 0x1f8   :  { %1835 = vperm.xlu1 %2121, %v1353_v17   ;;  %v1681_v47 = vpop.permute.xlu2 %1680 }
 0x1f9   :  { %v1873_v1 = vadd.f32 %v1681_v47, %v1579_v26  ;;  %v1874_v49 = vadd.f32 %v1681_v47, %v1580_v51  ;;  %v2213_v51 = vld [vmem:[%s5067_s0 + $0x10] sm:$0xff] }
 0x1fa   :  { %v4451_v7 = vpop.permute.xlu1 %1541  ;;  %v1571_v22 = vmul.f32 %v2213_v51, %v4147_v54  ;;  %v2216_v54 = vld [vmem:[%s5067_s0 + $0xb8] sm:$0xff] }
 0x1fb   :  { %v1957_v27 = vmax.f32 %v1873_v1, 0.0  ;;  %v1958_v60 = vmax.f32 %v1874_v49, 0.0  ;;  %1855 = vperm.xlu0 %2120, %v1357_v44   ;;  %v2215_v44 = vld [vmem:[%s5067_s0 + $0xb0] sm:$0xff]  ;;  %v1592_v2 = vmul.f32 %v2216_v54, %v4160_v45 }
 0x1fc   :  { %v1591_v61 = vmul.f32 %v2215_v44, %v4160_v45  ;;  %v2222_v44 = vld [vmem:[%s5067_s0 + $0xe8] sm:$0xff] }
 0x1fd   :  { %2041 = vst [vmem:[%s5070_s3 + $0x50] sm:$0xff] %v1957_v27  ;;  %v4459_v10 = vpop.permute.xlu0 %1561 }
 0x1fe   :  { %2042 = vst.msk [vmem:[%s5070_s3 + $0x58] sm:$0xff] %vm98_vm0, %v1958_v60  ;;  %1860 = vperm.xlu2 %2122, %v1358_v36   ;;  %v1569_v36 = vmul.f32 %v2217_v9, %v4170_v50 }
 0x200   :  { %1850 = vperm.xlu1 %2121, %v1356_v15   ;;  %v1696_v3 = vpop.permute.xlu2 %1695  ;;  %v2218_v15 = vld [vmem:[%s5067_s0 + $0x8] sm:$0xff] }
 0x201   :  { %v1879_v17 = vadd.f32 %v1696_v3, %v1585_v19  ;;  %v1880_v21 = vadd.f32 %v1696_v3, %v1586_v0  ;;  %v1570_v41 = vmul.f32 %v2218_v15, %v4170_v50  ;;  %v2219_v50 = vld [vmem:[%s5067_s0 + $0x40] sm:$0xff] }
 0x202   :  { %v4473_v56 = vpop.permute.xlu1 %1556 }
 0x203   :  { %v1963_v26 = vmax.f32 %v1879_v17, 0.0  ;;  %v1964_v6 = vmax.f32 %v1880_v21, 0.0 }
 0x205   :  { %2047 = vst [vmem:[%s5070_s3 + $0x80] sm:$0xff] %v1963_v26  ;;  %v1661_v47 = vpop.permute.xlu0 %1660  ;;  %v1577_v26 = vmul.f32 %v2219_v50, %v4177_v33 }
 0x206   :  { %2048 = vst.msk [vmem:[%s5070_s3 + $0x88] sm:$0xff] %vm98_vm0, %v1964_v6  ;;  %v1865_v1 = vadd.f32 %v1661_v47, %v1571_v22  ;;  %v1866_v49 = vadd.f32 %v1661_v47, %v1572_v5  ;;  %v2220_v6 = vld [vmem:[%s5067_s0 + $0x48] sm:$0xff] }
 0x207   :  { %v1578_v51 = vmul.f32 %v2220_v6, %v4177_v33 }
 0x208   :  { %v1711_v23 = vpop.permute.xlu2 %1710  ;;  %v1949_v27 = vmax.f32 %v1865_v1, 0.0  ;;  %v1950_v60 = vmax.f32 %v1866_v49, 0.0  ;;  %v2221_v49 = vld [vmem:[%s5067_s0 + $0xe0] sm:$0xff] }
 0x209   :  { %v1885_v19 = vadd.f32 %v1711_v23, %v1591_v61  ;;  %v1886_v43 = vadd.f32 %v1711_v23, %v1592_v2  ;;  %v1597_v33 = vmul.f32 %v2221_v49, %v4184_v16  ;;  %v1598_v61 = vmul.f32 %v2222_v44, %v4184_v16  ;;  %v2224_v16 = vld [vmem:[%s5067_s0 + $0x38] sm:$0xff]  ;;  %v2229_v44 = vld [vmem:[%s5067_s0 + $0x60] sm:$0xff] }
 0x20a   :  { %v1656_v0 = vpop.permute.xlu1 %1655  ;;  %2033 = vst [vmem:[%s5070_s3 + $0x10] sm:$0xff] %v1949_v27  ;;  %v2223_v27 = vld [vmem:[%s5067_s0 + $0x30] sm:$0xff]  ;;  %v1576_v9 = vmul.f32 %v2224_v16, %v4035_v32 }
 0x20b   :  { %v1969_v45 = vmax.f32 %v1885_v19, 0.0  ;;  %v1970_v3 = vmax.f32 %v1886_v43, 0.0  ;;  %v1863_v17 = vadd.f32 %v1656_v0, %v1569_v36  ;;  %v1864_v21 = vadd.f32 %v1656_v0, %v1570_v41  ;;  %2034 = vst.msk [vmem:[%s5070_s3 + $0x18] sm:$0xff] %vm98_vm0, %v1950_v60 }
 0x20c   :  { %v1575_v60 = vmul.f32 %v2223_v27, %v4035_v32  ;;  %v2225_v32 = vld [vmem:[%s5067_s0 + $0x70] sm:$0xff] }
 0x20d   :  { %2053 = vst [vmem:[%s5070_s3 + $0xb0] sm:$0xff] %v1969_v45  ;;  %v1947_v22 = vmax.f32 %v1863_v17, 0.0  ;;  %v1948_v25 = vmax.f32 %v1864_v21, 0.0  ;;  %v1676_v5 = vpop.permute.xlu0 %1675  ;;  %v2226_v17 = vld [vmem:[%s5067_s0 + $0x78] sm:$0xff] }
 0x20e   :  { %2054 = vst.msk [vmem:[%s5070_s3 + $0xb8] sm:$0xff] %vm98_vm0, %v1970_v3  ;;  %v1871_v47 = vadd.f32 %v1676_v5, %v1577_v26  ;;  %v1872_v1 = vadd.f32 %v1676_v5, %v1578_v51  ;;  %v1583_v3 = vmul.f32 %v2225_v32, %v4191_v13  ;;  %v1584_v21 = vmul.f32 %v2226_v17, %v4191_v13  ;;  %v2228_v5 = vld [vmem:[%s5067_s0 + $0x118] sm:$0xff]  ;;  %v2233_v17 = vld [vmem:[%s5067_s0 + $0x140] sm:$0xff] }
 0x20f   :  { %2031 = vst [vmem:[%s5070_s3] sm:$0xff] %v1947_v22 }
 0x210   :  { %2032 = vst.msk [vmem:[%s5070_s3 + $0x8] sm:$0xff] %vm98_vm0, %v1948_v25  ;;  %v1726_v54 = vpop.permute.xlu2 %1725  ;;  %v1955_v2 = vmax.f32 %v1871_v47, 0.0  ;;  %v1956_v23 = vmax.f32 %v1872_v1, 0.0  ;;  %v2227_v25 = vld [vmem:[%s5067_s0 + $0x110] sm:$0xff]  ;;  %v1604_v47 = vmul.f32 %v2228_v5, %v4210_v58 }
 0x211   :  { %v1891_v36 = vadd.f32 %v1726_v54, %v1597_v33  ;;  %v1892_v15 = vadd.f32 %v1726_v54, %v1598_v61  ;;  %v1603_v13 = vmul.f32 %v2227_v25, %v4210_v58  ;;  %v1581_v61 = vmul.f32 %v2229_v44, %v4200_v12  ;;  %v2230_v58 = vld [vmem:[%s5067_s0 + $0x68] sm:$0xff] }
 0x212   :  { %v1671_v41 = vpop.permute.xlu1 %1670  ;;  %2039 = vst [vmem:[%s5070_s3 + $0x40] sm:$0xff] %v1955_v2  ;;  %v1582_v54 = vmul.f32 %v2230_v58, %v4200_v12  ;;  %v2231_v12 = vld [vmem:[%s5067_s0 + $0xa0] sm:$0xff] }
 0x213   :  { %v1975_v19 = vmax.f32 %v1891_v36, 0.0  ;;  %v1976_v43 = vmax.f32 %v1892_v15, 0.0  ;;  %v1869_v0 = vadd.f32 %v1671_v41, %v1575_v60  ;;  %v1870_v45 = vadd.f32 %v1671_v41, %v1576_v9  ;;  %2040 = vst.msk [vmem:[%s5070_s3 + $0x48] sm:$0xff] %vm98_vm0, %v1956_v23  ;;  %v2232_v41 = vld [vmem:[%s5067_s0 + $0xa8] sm:$0xff] }
 0x214   :  { %v1589_v15 = vmul.f32 %v2231_v12, %v4217_v30  ;;  %v2240_v12 = vld [vmem:[%s5067_s0 + $0x178] sm:$0xff] }
 0x215   :  { %2059 = vst [vmem:[%s5070_s3 + $0xe0] sm:$0xff] %v1975_v19  ;;  %v1953_v50 = vmax.f32 %v1869_v0, 0.0  ;;  %v1954_v26 = vmax.f32 %v1870_v45, 0.0  ;;  %v1691_v6 = vpop.permute.xlu0 %1690  ;;  %v1590_v19 = vmul.f32 %v2232_v41, %v4217_v30  ;;  %v1609_v30 = vmul.f32 %v2233_v17, %v4231_v4 }
 0x216   :  { %2060 = vst.msk [vmem:[%s5070_s3 + $0xe8] sm:$0xff] %vm98_vm0, %v1976_v43  ;;  %v1877_v51 = vadd.f32 %v1691_v6, %v1583_v3  ;;  %v1878_v22 = vadd.f32 %v1691_v6, %v1584_v21  ;;  %v2234_v21 = vld [vmem:[%s5067_s0 + $0x148] sm:$0xff] }
 0x217   :  { %2037 = vst [vmem:[%s5070_s3 + $0x30] sm:$0xff] %v1953_v50  ;;  %v1610_v50 = vmul.f32 %v2234_v21, %v4231_v4  ;;  %v2236_v4 = vld [vmem:[%s5067_s0 + $0x98] sm:$0xff] }
 0x218   :  { %2038 = vst.msk [vmem:[%s5070_s3 + $0x38] sm:$0xff] %vm98_vm0, %v1954_v26  ;;  %v1741_v1 = vpop.permute.xlu2 %1740  ;;  %v1961_v49 = vmax.f32 %v1877_v51, 0.0  ;;  %v1962_v33 = vmax.f32 %v1878_v22, 0.0  ;;  %v2235_v22 = vld [vmem:[%s5067_s0 + $0x90] sm:$0xff] }
 0x219   :  { %v1897_v2 = vadd.f32 %v1741_v1, %v1603_v13  ;;  %v1898_v23 = vadd.f32 %v1741_v1, %v1604_v47  ;;  %v1587_v25 = vmul.f32 %v2235_v22, %v4226_v29  ;;  %v1588_v13 = vmul.f32 %v2236_v4, %v4226_v29  ;;  %v2237_v29 = vld [vmem:[%s5067_s0 + $0xd0] sm:$0xff]  ;;  %v2244_v22 = vld [vmem:[%s5067_s0 + $0x108] sm:$0xff] }
 0x21a   :  { %v1686_v27 = vpop.permute.xlu1 %1685  ;;  %2045 = vst [vmem:[%s5070_s3 + $0x70] sm:$0xff] %v1961_v49  ;;  %v1595_v58 = vmul.f32 %v2237_v29, %v4238_v11 }
 0x21b   :  { %v1981_v60 = vmax.f32 %v1897_v2, 0.0  ;;  %v1982_v16 = vmax.f32 %v1898_v23, 0.0  ;;  %v1875_v9 = vadd.f32 %v1686_v27, %v1581_v61  ;;  %v1876_v36 = vadd.f32 %v1686_v27, %v1582_v54  ;;  %2046 = vst.msk [vmem:[%s5070_s3 + $0x78] sm:$0xff] %vm98_vm0, %v1962_v33  ;;  %v2238_v54 = vld [vmem:[%s5067_s0 + $0xd8] sm:$0xff] }
 0x21c   :  { %v1596_v2 = vmul.f32 %v2238_v54, %v4238_v11  ;;  %v2247_v54 = vld [vmem:[%s5067_s0 + $0xf0] sm:$0xff] }
 0x21d   :  { %2065 = vst [vmem:[%s5070_s3 + $0x110] sm:$0xff] %v1981_v60  ;;  %v1959_v43 = vmax.f32 %v1875_v9, 0.0  ;;  %v1960_v0 = vmax.f32 %v1876_v36, 0.0  ;;  %v1706_v45 = vpop.permute.xlu0 %1705  ;;  %v2239_v36 = vld [vmem:[%s5067_s0 + $0x170] sm:$0xff] }
 0x21e   :  { %2066 = vst.msk [vmem:[%s5070_s3 + $0x118] sm:$0xff] %vm98_vm0, %v1982_v16  ;;  %v1883_v32 = vadd.f32 %v1706_v45, %v1589_v15  ;;  %v1884_v3 = vadd.f32 %v1706_v45, %v1590_v19  ;;  %v1615_v11 = vmul.f32 %v2239_v36, %v4252_v40  ;;  %v1616_v15 = vmul.f32 %v2240_v12, %v4252_v40  ;;  %v2242_v40 = vld [vmem:[%s5067_s0 + $0xc8] sm:$0xff] }
 0x21f   :  { %2043 = vst [vmem:[%s5070_s3 + $0x60] sm:$0xff] %v1959_v43 }
 0x220   :  { %2044 = vst.msk [vmem:[%s5070_s3 + $0x68] sm:$0xff] %vm98_vm0, %v1960_v0  ;;  %v1756_v26 = vpop.permute.xlu2 %1755  ;;  %v1967_v6 = vmax.f32 %v1883_v32, 0.0  ;;  %v1968_v51 = vmax.f32 %v1884_v3, 0.0  ;;  %v2241_v0 = vld [vmem:[%s5067_s0 + $0xc0] sm:$0xff]  ;;  %v1594_v32 = vmul.f32 %v2242_v40, %v4247_v57 }
 0x221   :  { %v1903_v5 = vadd.f32 %v1756_v26, %v1609_v30  ;;  %v1904_v47 = vadd.f32 %v1756_v26, %v1610_v50  ;;  %v1593_v45 = vmul.f32 %v2241_v0, %v4247_v57  ;;  %v2243_v57 = vld [vmem:[%s5067_s0 + $0x100] sm:$0xff] }
 0x222   :  { %v1701_v1 = vpop.permute.xlu1 %1700  ;;  %2051 = vst [vmem:[%s5070_s3 + $0xa0] sm:$0xff] %v1967_v6 }
 0x223   :  { %v1987_v49 = vmax.f32 %v1903_v5, 0.0  ;;  %v1988_v33 = vmax.f32 %v1904_v47, 0.0  ;;  %v1881_v44 = vadd.f32 %v1701_v1, %v1587_v25  ;;  %v1882_v61 = vadd.f32 %v1701_v1, %v1588_v13  ;;  %2052 = vst.msk [vmem:[%s5070_s3 + $0xa8] sm:$0xff] %vm98_vm0, %v1968_v51 }
 0x224   :  { %v1601_v51 = vmul.f32 %v2243_v57, %v4264_v46  ;;  %v1602_v25 = vmul.f32 %v2244_v22, %v4264_v46 }
 0x225   :  { %2071 = vst [vmem:[%s5070_s3 + $0x140] sm:$0xff] %v1987_v49  ;;  %v1965_v23 = vmax.f32 %v1881_v44, 0.0  ;;  %v1966_v27 = vmax.f32 %v1882_v61, 0.0  ;;  %v1721_v60 = vpop.permute.xlu0 %1720  ;;  %v2245_v49 = vld [vmem:[%s5067_s0 + $0x1a0] sm:$0xff] }
 0x226   :  { %2072 = vst.msk [vmem:[%s5070_s3 + $0x148] sm:$0xff] %vm98_vm0, %v1988_v33  ;;  %v1889_v16 = vadd.f32 %v1721_v60, %v1595_v58  ;;  %v1890_v9 = vadd.f32 %v1721_v60, %v1596_v2  ;;  %v1621_v46 = vmul.f32 %v2245_v49, %v4275_v55  ;;  %v2246_v33 = vld [vmem:[%s5067_s0 + $0x1a8] sm:$0xff]  ;;  %v1599_v2 = vmul.f32 %v2247_v54, %v4271_v42 }
 0x227   :  { %2049 = vst [vmem:[%s5070_s3 + $0x90] sm:$0xff] %v1965_v23  ;;  %v1622_v44 = vmul.f32 %v2246_v33, %v4275_v55  ;;  %v2248_v55 = vld [vmem:[%s5067_s0 + $0xf8] sm:$0xff] }
 0x228   :  { %2050 = vst.msk [vmem:[%s5070_s3 + $0x98] sm:$0xff] %vm98_vm0, %v1966_v27  ;;  %v1771_v41 = vpop.permute.xlu2 %1770  ;;  %v1973_v19 = vmax.f32 %v1889_v16, 0.0  ;;  %v1974_v43 = vmax.f32 %v1890_v9, 0.0  ;;  %v1600_v23 = vmul.f32 %v2248_v55, %v4271_v42  ;;  %v2249_v42 = vld [vmem:[%s5067_s0 + $0x130] sm:$0xff]  ;;  %v2258_v55 = vld [vmem:[%s5067_s0 + $0x208] sm:$0xff] }
 0x229   :  { %v1909_v3 = vadd.f32 %v1771_v41, %v1615_v11  ;;  %v1910_v17 = vadd.f32 %v1771_v41, %v1616_v15  ;;  %v1607_v15 = vmul.f32 %v2249_v42, %v4290_v14  ;;  %v2250_v41 = vld [vmem:[%s5067_s0 + $0x138] sm:$0xff] }
 0x22a   :  { %v1716_v30 = vpop.permute.xlu1 %1715  ;;  %2057 = vst [vmem:[%s5070_s3 + $0xd0] sm:$0xff] %v1973_v19  ;;  %v1608_v19 = vmul.f32 %v2250_v41, %v4290_v14 }
 0x22b   :  { %v1993_v21 = vmax.f32 %v1909_v3, 0.0  ;;  %v1994_v50 = vmax.f32 %v1910_v17, 0.0  ;;  %v1887_v26 = vadd.f32 %v1716_v30, %v1593_v45  ;;  %v1888_v6 = vadd.f32 %v1716_v30, %v1594_v32  ;;  %2058 = vst.msk [vmem:[%s5070_s3 + $0xd8] sm:$0xff] %vm98_vm0, %v1974_v43  ;;  %v2251_v3 = vld [vmem:[%s5067_s0 + $0x1d0] sm:$0xff]  ;;  %v2252_v17 = vld [vmem:[%s5067_s0 + $0x1d8] sm:$0xff] }
 0x22c   :  { %v1627_v14 = vmul.f32 %v2251_v3, %v4301_v20  ;;  %v1628_v30 = vmul.f32 %v2252_v17, %v4301_v20  ;;  %v2254_v20 = vld [vmem:[%s5067_s0 + $0x128] sm:$0xff] }
 0x22d   :  { %2077 = vst [vmem:[%s5070_s3 + $0x170] sm:$0xff] %v1993_v21  ;;  %v1971_v4 = vmax.f32 %v1887_v26, 0.0  ;;  %v1972_v13 = vmax.f32 %v1888_v6, 0.0  ;;  %v1736_v5 = vpop.permute.xlu0 %1735  ;;  %v2253_v6 = vld [vmem:[%s5067_s0 + $0x120] sm:$0xff] }
 0x22e   :  { %2078 = vst.msk [vmem:[%s5070_s3 + $0x178] sm:$0xff] %vm98_vm0, %v1994_v50  ;;  %v1895_v47 = vadd.f32 %v1736_v5, %v1601_v51  ;;  %v1896_v1 = vadd.f32 %v1736_v5, %v1602_v25  ;;  %v1605_v57 = vmul.f32 %v2253_v6, %v4292_v48  ;;  %v1606_v51 = vmul.f32 %v2254_v20, %v4292_v48  ;;  %v2255_v48 = vld [vmem:[%s5067_s0 + $0x160] sm:$0xff] }
 0x22f   :  { %2055 = vst [vmem:[%s5070_s3 + $0xc0] sm:$0xff] %v1971_v4  ;;  %v1613_v49 = vmul.f32 %v2255_v48, %v4311_v39 }
 0x230   :  { %2056 = vst.msk [vmem:[%s5070_s3 + $0xc8] sm:$0xff] %vm98_vm0, %v1972_v13  ;;  %v1786_v61 = vpop.permute.xlu2 %1785  ;;  %v1979_v29 = vmax.f32 %v1895_v47, 0.0  ;;  %v1980_v58 = vmax.f32 %v1896_v1, 0.0 }
 0x231   :  { %v1915_v27 = vadd.f32 %v1786_v61, %v1621_v46  ;;  %v1916_v60 = vadd.f32 %v1786_v61, %v1622_v44  ;;  %v2256_v46 = vld [vmem:[%s5067_s0 + $0x168] sm:$0xff] }
 0x232   :  { %v1731_v16 = vpop.permute.xlu1 %1730  ;;  %2063 = vst [vmem:[%s5070_s3 + $0x100] sm:$0xff] %v1979_v29  ;;  %v1614_v33 = vmul.f32 %v2256_v46, %v4311_v39 }
 0x233   :  { %v1999_v9 = vmax.f32 %v1915_v27, 0.0  ;;  %v2000_v36 = vmax.f32 %v1916_v60, 0.0  ;;  %v1893_v11 = vadd.f32 %v1731_v16, %v1599_v2  ;;  %v1894_v12 = vadd.f32 %v1731_v16, %v1600_v23  ;;  %2064 = vst.msk [vmem:[%s5070_s3 + $0x108] sm:$0xff] %vm98_vm0, %v1980_v58  ;;  %v2257_v2 = vld [vmem:[%s5067_s0 + $0x200] sm:$0xff] }
 0x234   :  { %v1633_v39 = vmul.f32 %v2257_v2, %v4322_v35  ;;  %v1634_v23 = vmul.f32 %v2258_v55, %v4322_v35  ;;  %v2260_v35 = vld [vmem:[%s5067_s0 + $0x158] sm:$0xff]  ;;  %v2269_v55 = vld [vmem:[%s5067_s0 + $0x260] sm:$0xff] }
 0x235   :  { %2083 = vst [vmem:[%s5070_s3 + $0x1a0] sm:$0xff] %v1999_v9  ;;  %v1977_v43 = vmax.f32 %v1893_v11, 0.0  ;;  %v1978_v0 = vmax.f32 %v1894_v12, 0.0  ;;  %v1751_v45 = vpop.permute.xlu0 %1750  ;;  %v2259_v9 = vld [vmem:[%s5067_s0 + $0x150] sm:$0xff]  ;;  %v1612_v11 = vmul.f32 %v2260_v35, %v4318_v8 }
 0x236   :  { %2084 = vst.msk [vmem:[%s5070_s3 + $0x1a8] sm:$0xff] %vm98_vm0, %v2000_v36  ;;  %v1901_v40 = vadd.f32 %v1751_v45, %v1607_v15  ;;  %v1902_v32 = vadd.f32 %v1751_v45, %v1608_v19  ;;  %v1611_v36 = vmul.f32 %v2259_v9, %v4318_v8  ;;  %v2261_v8 = vld [vmem:[%s5067_s0 + $0x190] sm:$0xff] }
 0x237   :  { %2061 = vst [vmem:[%s5070_s3 + $0xf0] sm:$0xff] %v1977_v43  ;;  %v1619_v45 = vmul.f32 %v2261_v8, %v4334_v38 }
 0x238   :  { %2062 = vst.msk [vmem:[%s5070_s3 + $0xf8] sm:$0xff] %vm98_vm0, %v1978_v0  ;;  %v1801_v21 = vpop.permute.xlu2 %1800  ;;  %v1985_v50 = vmax.f32 %v1901_v40, 0.0  ;;  %v1986_v26 = vmax.f32 %v1902_v32, 0.0  ;;  %v2262_v40 = vld [vmem:[%s5067_s0 + $0x198] sm:$0xff] }
 0x239   :  { %v1921_v22 = vadd.f32 %v1801_v21, %v1627_v14  ;;  %v1922_v25 = vadd.f32 %v1801_v21, %v1628_v30  ;;  %v1620_v32 = vmul.f32 %v2262_v40, %v4334_v38 }
 0x23a   :  { %v1746_v4 = vpop.permute.xlu1 %1745  ;;  %2069 = vst [vmem:[%s5070_s3 + $0x130] sm:$0xff] %v1985_v50  ;;  %v2263_v50 = vld [vmem:[%s5067_s0 + $0x230] sm:$0xff] }
 0x23b   :  { %v2005_v13 = vmax.f32 %v1921_v22, 0.0  ;;  %v2006_v5 = vmax.f32 %v1922_v25, 0.0  ;;  %v1899_v47 = vadd.f32 %v1746_v4, %v1605_v57  ;;  %v1900_v1 = vadd.f32 %v1746_v4, %v1606_v51  ;;  %2070 = vst.msk [vmem:[%s5070_s3 + $0x138] sm:$0xff] %vm98_vm0, %v1986_v26  ;;  %v2264_v26 = vld [vmem:[%s5067_s0 + $0x238] sm:$0xff]  ;;  %v2265_v22 = vld [vmem:[%s5067_s0 + $0x180] sm:$0xff] }
 0x23c   :  { %v1639_v38 = vmul.f32 %v2263_v50, %v4341_v52  ;;  %v1640_v6 = vmul.f32 %v2264_v26, %v4341_v52  ;;  %v1617_v25 = vmul.f32 %v2265_v22, %v4343_v53  ;;  %v2266_v52 = vld [vmem:[%s5067_s0 + $0x188] sm:$0xff]  ;;  %v2276_v50 = vld [vmem:[%s5067_s0 + $0x298] sm:$0xff] }
 0x23d   :  { %2089 = vst [vmem:[%s5070_s3 + $0x1d0] sm:$0xff] %v2005_v13  ;;  %v1983_v44 = vmax.f32 %v1899_v47, 0.0  ;;  %v1984_v61 = vmax.f32 %v1900_v1, 0.0  ;;  %v1766_v29 = vpop.permute.xlu0 %1765  ;;  %v1618_v4 = vmul.f32 %v2266_v52, %v4343_v53  ;;  %v2267_v53 = vld [vmem:[%s5067_s0 + $0x1c0] sm:$0xff] }
 0x23e   :  { %2090 = vst.msk [vmem:[%s5070_s3 + $0x1d8] sm:$0xff] %vm98_vm0, %v2006_v5  ;;  %v1907_v58 = vadd.f32 %v1766_v29, %v1613_v49  ;;  %v1908_v54 = vadd.f32 %v1766_v29, %v1614_v33  ;;  %v1625_v33 = vmul.f32 %v2267_v53, %v4355_v31 }
 0x23f   :  { %2067 = vst [vmem:[%s5070_s3 + $0x120] sm:$0xff] %v1983_v44  ;;  %v2268_v44 = vld [vmem:[%s5067_s0 + $0x1c8] sm:$0xff] }
 0x240   :  { %2068 = vst.msk [vmem:[%s5070_s3 + $0x128] sm:$0xff] %vm98_vm0, %v1984_v61  ;;  %v1816_v27 = vpop.permute.xlu2 %1815  ;;  %v1991_v60 = vmax.f32 %v1907_v58, 0.0  ;;  %v1992_v16 = vmax.f32 %v1908_v54, 0.0  ;;  %v1626_v61 = vmul.f32 %v2268_v44, %v4355_v31  ;;  %v1645_v31 = vmul.f32 %v2269_v55, %v4362_v18 }
 0x241   :  { %v1927_v12 = vadd.f32 %v1816_v27, %v1633_v39  ;;  %v1928_v42 = vadd.f32 %v1816_v27, %v1634_v23  ;;  %v2270_v23 = vld [vmem:[%s5067_s0 + $0x268] sm:$0xff] }
 0x242   :  { %v1761_v15 = vpop.permute.xlu1 %1760  ;;  %2075 = vst [vmem:[%s5070_s3 + $0x160] sm:$0xff] %v1991_v60  ;;  %v1646_v27 = vmul.f32 %v2270_v23, %v4362_v18  ;;  %v2272_v18 = vld [vmem:[%s5067_s0 + $0x1b8] sm:$0xff] }
 0x243   :  { %v2011_v41 = vmax.f32 %v1927_v12, 0.0  ;;  %v2012_v19 = vmax.f32 %v1928_v42, 0.0  ;;  %v1905_v43 = vadd.f32 %v1761_v15, %v1611_v36  ;;  %v1906_v0 = vadd.f32 %v1761_v15, %v1612_v11  ;;  %2076 = vst.msk [vmem:[%s5070_s3 + $0x168] sm:$0xff] %vm98_vm0, %v1992_v16  ;;  %v2271_v36 = vld [vmem:[%s5067_s0 + $0x1b0] sm:$0xff] }
 0x244   :  { %v1623_v35 = vmul.f32 %v2271_v36, %v4369_v34  ;;  %v1624_v11 = vmul.f32 %v2272_v18, %v4369_v34  ;;  %v2273_v34 = vld [vmem:[%s5067_s0 + $0x1f0] sm:$0xff] }
 0x245   :  { %2095 = vst [vmem:[%s5070_s3 + $0x200] sm:$0xff] %v2011_v41  ;;  %v1989_v3 = vmax.f32 %v1905_v43, 0.0  ;;  %v1990_v14 = vmax.f32 %v1906_v0, 0.0  ;;  %v1781_v17 = vpop.permute.xlu0 %1780  ;;  %v1631_v8 = vmul.f32 %v2273_v34, %v4376_v63 }
 0x246   :  { %2096 = vst.msk [vmem:[%s5070_s3 + $0x208] sm:$0xff] %vm98_vm0, %v2012_v19  ;;  %v1913_v30 = vadd.f32 %v1781_v17, %v1619_v45  ;;  %v1914_v21 = vadd.f32 %v1781_v17, %v1620_v32  ;;  %v2274_v45 = vld [vmem:[%s5067_s0 + $0x1f8] sm:$0xff] }
 0x247   :  { %2073 = vst [vmem:[%s5070_s3 + $0x150] sm:$0xff] %v1989_v3  ;;  %v1632_v40 = vmul.f32 %v2274_v45, %v4376_v63  ;;  %v2287_v45 = vld [vmem:[%s5067_s0 + $0x280] sm:$0xff] }
 0x248   :  { %2074 = vst.msk [vmem:[%s5070_s3 + $0x158] sm:$0xff] %vm98_vm0, %v1990_v14  ;;  %v1831_v57 = vpop.permute.xlu2 %1830  ;;  %v1997_v20 = vmax.f32 %v1913_v30, 0.0  ;;  %v1998_v51 = vmax.f32 %v1914_v21, 0.0  ;;  %v2275_v21 = vld [vmem:[%s5067_s0 + $0x290] sm:$0xff] }
 0x249   :  { %v1933_v13 = vadd.f32 %v1831_v57, %v1639_v38  ;;  %v1934_v5 = vadd.f32 %v1831_v57, %v1640_v6  ;;  %v1651_v63 = vmul.f32 %v2275_v21, %v4383_v24  ;;  %v1652_v38 = vmul.f32 %v2276_v50, %v4383_v24  ;;  %v2278_v24 = vld [vmem:[%s5067_s0 + $0x1e8] sm:$0xff] }
 0x24a   :  { %v1776_v47 = vpop.permute.xlu1 %1775  ;;  %2081 = vst [vmem:[%s5070_s3 + $0x190] sm:$0xff] %v1997_v20  ;;  %v2277_v20 = vld [vmem:[%s5067_s0 + $0x1e0] sm:$0xff]  ;;  %v1630_v22 = vmul.f32 %v2278_v24, %v4390_v59 }
 0x24b   :  { %v2017_v1 = vmax.f32 %v1933_v13, 0.0  ;;  %v2018_v48 = vmax.f32 %v1934_v5, 0.0  ;;  %v1911_v49 = vadd.f32 %v1776_v47, %v1617_v25  ;;  %v1912_v46 = vadd.f32 %v1776_v47, %v1618_v4  ;;  %2082 = vst.msk [vmem:[%s5070_s3 + $0x198] sm:$0xff] %vm98_vm0, %v1998_v51 }
 0x24c   :  { %v1629_v51 = vmul.f32 %v2277_v20, %v4390_v59  ;;  %v2279_v59 = vld [vmem:[%s5067_s0 + $0x220] sm:$0xff] }
 0x24d   :  { %2101 = vst [vmem:[%s5070_s3 + $0x230] sm:$0xff] %v2017_v1  ;;  %v1995_v29 = vmax.f32 %v1911_v49, 0.0  ;;  %v1996_v58 = vmax.f32 %v1912_v46, 0.0  ;;  %v1796_v54 = vpop.permute.xlu0 %1795  ;;  %v2280_v49 = vld [vmem:[%s5067_s0 + $0x228] sm:$0xff] }
 0x24e   :  { %2102 = vst.msk [vmem:[%s5070_s3 + $0x238] sm:$0xff] %vm98_vm0, %v2018_v48  ;;  %v1919_v2 = vadd.f32 %v1796_v54, %v1625_v33  ;;  %v1920_v39 = vadd.f32 %v1796_v54, %v1626_v61  ;;  %v1637_v48 = vmul.f32 %v2279_v59, %v4397_v62  ;;  %v1638_v46 = vmul.f32 %v2280_v49, %v4397_v62  ;;  %v2281_v54 = vld [vmem:[%s5067_s0 + $0x210] sm:$0xff] }
 0x24f   :  { %2079 = vst [vmem:[%s5070_s3 + $0x180] sm:$0xff] %v1995_v29 }
 0x250   :  { %2080 = vst.msk [vmem:[%s5070_s3 + $0x188] sm:$0xff] %vm98_vm0, %v1996_v58  ;;  %v1846_v60 = vpop.permute.xlu2 %1845  ;;  %v2003_v16 = vmax.f32 %v1919_v2, 0.0  ;;  %v2004_v9 = vmax.f32 %v1920_v39, 0.0  ;;  %v1635_v2 = vmul.f32 %v2281_v54, %v4417_v28  ;;  %v2282_v39 = vld [vmem:[%s5067_s0 + $0x218] sm:$0xff] }
 0x251   :  { %v1939_v12 = vadd.f32 %v1846_v60, %v1645_v31  ;;  %v1940_v42 = vadd.f32 %v1846_v60, %v1646_v27  ;;  %v1636_v55 = vmul.f32 %v2282_v39, %v4417_v28  ;;  %v2283_v60 = vld [vmem:[%s5067_s0 + $0x250] sm:$0xff]  ;;  %v2284_v28 = vld [vmem:[%s5067_s0 + $0x258] sm:$0xff] }
 0x252   :  { %v1791_v15 = vpop.permute.xlu1 %1790  ;;  %2087 = vst [vmem:[%s5070_s3 + $0x1c0] sm:$0xff] %v2003_v16  ;;  %v1643_v16 = vmul.f32 %v2283_v60, %v4427_v37 }
 0x253   :  { %v2023_v41 = vmax.f32 %v1939_v12, 0.0  ;;  %v2024_v19 = vmax.f32 %v1940_v42, 0.0  ;;  %v1917_v43 = vadd.f32 %v1791_v15, %v1623_v35  ;;  %v1918_v0 = vadd.f32 %v1791_v15, %v1624_v11  ;;  %2088 = vst.msk [vmem:[%s5070_s3 + $0x1c8] sm:$0xff] %vm98_vm0, %v2004_v9 }
 0x254   :  { %v1644_v9 = vmul.f32 %v2284_v28, %v4427_v37  ;;  %v2285_v37 = vld [vmem:[%s5067_s0 + $0x240] sm:$0xff] }
 0x255   :  { %2107 = vst [vmem:[%s5070_s3 + $0x260] sm:$0xff] %v2023_v41  ;;  %v2001_v32 = vmax.f32 %v1917_v43, 0.0  ;;  %v2002_v3 = vmax.f32 %v1918_v0, 0.0  ;;  %v1811_v14 = vpop.permute.xlu0 %1810  ;;  %v1641_v41 = vmul.f32 %v2285_v37, %v4451_v7 }
 0x256   :  { %2108 = vst.msk [vmem:[%s5070_s3 + $0x268] sm:$0xff] %vm98_vm0, %v2024_v19  ;;  %v1925_v17 = vadd.f32 %v1811_v14, %v1631_v8  ;;  %v1926_v30 = vadd.f32 %v1811_v14, %v1632_v40  ;;  %v2286_v19 = vld [vmem:[%s5067_s0 + $0x248] sm:$0xff]  ;;  %v1649_v40 = vmul.f32 %v2287_v45, %v4459_v10 }
 0x257   :  { %2085 = vst [vmem:[%s5070_s3 + $0x1b0] sm:$0xff] %v2001_v32  ;;  %v1642_v43 = vmul.f32 %v2286_v19, %v4451_v7  ;;  %v2288_v7 = vld [vmem:[%s5067_s0 + $0x288] sm:$0xff] }
 0x258   :  { %2086 = vst.msk [vmem:[%s5070_s3 + $0x1b8] sm:$0xff] %vm98_vm0, %v2002_v3  ;;  %v1861_v26 = vpop.permute.xlu2 %1860  ;;  %v2009_v6 = vmax.f32 %v1925_v17, 0.0  ;;  %v2010_v57 = vmax.f32 %v1926_v30, 0.0  ;;  %v1650_v32 = vmul.f32 %v2288_v7, %v4459_v10  ;;  %v2289_v10 = vld [vmem:[%s5067_s0 + $0x270] sm:$0xff] }
 0x259   :  { %v1945_v25 = vadd.f32 %v1861_v26, %v1651_v63  ;;  %v1946_v52 = vadd.f32 %v1861_v26, %v1652_v38  ;;  %v1647_v38 = vmul.f32 %v2289_v10, %v4473_v56  ;;  %v2290_v26 = vld [vmem:[%s5067_s0 + $0x278] sm:$0xff] }
 0x25a   :  { %v1806_v4 = vpop.permute.xlu1 %1805  ;;  %2093 = vst [vmem:[%s5070_s3 + $0x1f0] sm:$0xff] %v2009_v6  ;;  %v1648_v6 = vmul.f32 %v2290_v26, %v4473_v56 }
 0x25b   :  { %v2029_v13 = vmax.f32 %v1945_v25, 0.0  ;;  %v2030_v5 = vmax.f32 %v1946_v52, 0.0  ;;  %v1923_v47 = vadd.f32 %v1806_v4, %v1629_v51  ;;  %v1924_v1 = vadd.f32 %v1806_v4, %v1630_v22  ;;  %2094 = vst.msk [vmem:[%s5070_s3 + $0x1f8] sm:$0xff] %vm98_vm0, %v2010_v57 }
 0x25d   :  { %2113 = vst [vmem:[%s5070_s3 + $0x290] sm:$0xff] %v2029_v13  ;;  %v2007_v53 = vmax.f32 %v1923_v47, 0.0  ;;  %v2008_v33 = vmax.f32 %v1924_v1, 0.0  ;;  %v1826_v44 = vpop.permute.xlu0 %1825 }
 0x25e   :  { %2114 = vst.msk [vmem:[%s5070_s3 + $0x298] sm:$0xff] %vm98_vm0, %v2030_v5  ;;  %v1931_v61 = vadd.f32 %v1826_v44, %v1637_v48  ;;  %v1932_v29 = vadd.f32 %v1826_v44, %v1638_v46 }
 0x25f   :  { %2091 = vst [vmem:[%s5070_s3 + $0x1e0] sm:$0xff] %v2007_v53 }
 0x260   :  { %2092 = vst.msk [vmem:[%s5070_s3 + $0x1e8] sm:$0xff] %vm98_vm0, %v2008_v33  ;;  %v2015_v62 = vmax.f32 %v1931_v61, 0.0  ;;  %v2016_v58 = vmax.f32 %v1932_v29, 0.0 }
 0x262   :  { %v1821_v31 = vpop.permute.xlu1 %1820  ;;  %2099 = vst [vmem:[%s5070_s3 + $0x220] sm:$0xff] %v2015_v62 }
 0x263   :  { %v1929_v23 = vadd.f32 %v1821_v31, %v1635_v2  ;;  %v1930_v27 = vadd.f32 %v1821_v31, %v1636_v55  ;;  %2100 = vst.msk [vmem:[%s5070_s3 + $0x228] sm:$0xff] %vm98_vm0, %v2016_v58 }
 0x265   :  { %v2013_v36 = vmax.f32 %v1929_v23, 0.0  ;;  %v2014_v35 = vmax.f32 %v1930_v27, 0.0  ;;  %v1841_v18 = vpop.permute.xlu0 %1840 }
 0x266   :  { %v1937_v11 = vadd.f32 %v1841_v18, %v1643_v16  ;;  %v1938_v12 = vadd.f32 %v1841_v18, %v1644_v9 }
 0x267   :  { %2097 = vst [vmem:[%s5070_s3 + $0x210] sm:$0xff] %v2013_v36 }
 0x268   :  { %2098 = vst.msk [vmem:[%s5070_s3 + $0x218] sm:$0xff] %vm98_vm0, %v2014_v35  ;;  %v2021_v42 = vmax.f32 %v1937_v11, 0.0  ;;  %v2022_v15 = vmax.f32 %v1938_v12, 0.0 }
 0x26a   :  { %v1836_v0 = vpop.permute.xlu1 %1835  ;;  %2105 = vst [vmem:[%s5070_s3 + $0x250] sm:$0xff] %v2021_v42 }
 0x26b   :  { %v1935_v34 = vadd.f32 %v1836_v0, %v1641_v41  ;;  %v1936_v8 = vadd.f32 %v1836_v0, %v1642_v43  ;;  %2106 = vst.msk [vmem:[%s5070_s3 + $0x258] sm:$0xff] %vm98_vm0, %v2022_v15 }
 0x26d   :  { %v2019_v3 = vmax.f32 %v1935_v34, 0.0  ;;  %v2020_v14 = vmax.f32 %v1936_v8, 0.0  ;;  %v1856_v17 = vpop.permute.xlu0 %1855 }
 0x26e   :  { %v1943_v30 = vadd.f32 %v1856_v17, %v1649_v40  ;;  %v1944_v21 = vadd.f32 %v1856_v17, %v1650_v32 }
 0x26f   :  { %2103 = vst [vmem:[%s5070_s3 + $0x240] sm:$0xff] %v2019_v3 }
 0x270   :  { %2104 = vst.msk [vmem:[%s5070_s3 + $0x248] sm:$0xff] %vm98_vm0, %v2020_v14  ;;  %v2027_v63 = vmax.f32 %v1943_v30, 0.0  ;;  %v2028_v50 = vmax.f32 %v1944_v21, 0.0 }
 0x272   :  { %v1851_v57 = vpop.permute.xlu1 %1850  ;;  %2111 = vst [vmem:[%s5070_s3 + $0x280] sm:$0xff] %v2027_v63 }
 0x273   :  { %v1941_v20 = vadd.f32 %v1851_v57, %v1647_v38  ;;  %v1942_v51 = vadd.f32 %v1851_v57, %v1648_v6  ;;  %2112 = vst.msk [vmem:[%s5070_s3 + $0x288] sm:$0xff] %vm98_vm0, %v2028_v50 }
 0x275   :  { %v2025_v24 = vmax.f32 %v1941_v20, 0.0  ;;  %v2026_v22 = vmax.f32 %v1942_v51, 0.0 }
 0x277   :  { %2109 = vst [vmem:[%s5070_s3 + $0x270] sm:$0xff] %v2025_v24 }
 0x278   :  { %2110 = vst.msk [vmem:[%s5070_s3 + $0x278] sm:$0xff] %vm98_vm0, %v2026_v22 }

</bundles_post_ra>
